<compile_context>
chip_gen: v7x
topology: tpu7x:2x2x1
jax: 0.10.0
libtpu: 0.0.40
codegen_flags: <defaults>
</compile_context>

<pallas_src>
import functools

import jax
import jax.numpy as jnp
from jax.experimental import pallas as pl
from jax.experimental.pallas import tpu as pltpu


def _round_up(a, m):
    return (a + m - 1) // m * m


def _cdiv(a, b):
    return (a + b - 1) // b


# ----------------------------------------------------------------------------
# Kernel
# ----------------------------------------------------------------------------
def _vae_forward_kernel(
    x_ref, eps_ref,
    ew1_ref, eb1_ref, ew2_ref, eb2_ref, ewh_ref, ebh_ref,
    dw1_ref, db1_ref, dw2_ref, db2_ref, dw3_ref, db3_ref,
    xhat_ref, loss_ref,
    *, latent_dim, lv_off, batch, tile_b,
):
    f32 = jnp.float32
    bf16 = jnp.bfloat16

    x = x_ref[...].astype(f32)                                   # (tile_b, input_dim)

    # Row-validity mask (batch may be padded up to a multiple of tile_b).
    row0 = pl.program_id(0) * tile_b
    rows = row0 + jax.lax.broadcasted_iota(jnp.int32, (tile_b, 1), 0)
    valid = (rows < batch).astype(f32)                           # (tile_b, 1)

    # ---------------- encoder (bf16 MXU inputs, f32 accumulation) ----------------
    h = jnp.dot(x.astype(bf16), ew1_ref[...], preferred_element_type=f32) + eb1_ref[...]
    h = jnp.maximum(h, 0.0)
    h = jnp.dot(h.astype(bf16), ew2_ref[...], preferred_element_type=f32) + eb2_ref[...]
    h = jnp.maximum(h, 0.0)
    # fused mu|logvar head: mu at lanes [0:L], logvar at lanes [lv_off:lv_off+L]
    head = jnp.dot(h.astype(bf16), ewh_ref[...], preferred_element_type=f32) + ebh_ref[...]
    mu = head[:, :latent_dim]
    logvar = head[:, lv_off:lv_off + latent_dim]

    # ---- reparametrize: z = mu + s*eps with s = exp(logvar/2); reuse s*s in KLD ----
    s = jnp.exp(0.5 * logvar)
    z = mu + s * eps_ref[...].astype(f32)

    # ---------------- decoder ----------------
    d = jnp.dot(z.astype(bf16), dw1_ref[...], preferred_element_type=f32) + db1_ref[...]
    d = jnp.maximum(d, 0.0)
    d = jnp.dot(d.astype(bf16), dw2_ref[...], preferred_element_type=f32) + db2_ref[...]
    d = jnp.maximum(d, 0.0)
    logits = jnp.dot(d.astype(bf16), dw3_ref[...], preferred_element_type=f32) + db3_ref[...]

    # ---- shared transcendental: e = exp(-|l|) feeds both sigmoid and BCE ----
    abs_l = jnp.abs(logits)
    e = jnp.exp(-abs_l)
    inv_1pe = pl.reciprocal(1.0 + e, approx=True)                # EUP vrcp, ~free slot
    x_hat = jnp.where(logits >= 0.0, inv_1pe, e * inv_1pe)       # sigmoid(logits)
    xhat_ref[...] = x_hat.astype(xhat_ref.dtype)

    # BCE(sigmoid(l), x) per element = max(l,0) - x*l + log1p(exp(-|l|))
    bce_elem = jnp.maximum(logits, 0.0) - x * logits + jnp.log1p(e)
    bce_row = jnp.sum(bce_elem, axis=-1, keepdims=True)                       # (tile_b, 1)
    kld_row = -0.5 * jnp.sum(1.0 + logvar - mu * mu - s * s,
                             axis=-1, keepdims=True)                           # (tile_b, 1)
    partial = jnp.sum(valid * (bce_row + kld_row), keepdims=True)              # (1, 1)
    loss_ref[0] = partial.astype(loss_ref.dtype)


# ----------------------------------------------------------------------------
# One-time parameter preparation (hoisted out of the per-call path)
# ----------------------------------------------------------------------------
def prepare_params(params, latent_dim):
    """Fuse the mu|logvar head (logvar at a 128-lane-aligned offset) and cast
    the matmul weights to bf16.  Call once; reuse across forward calls."""
    (ew1, eb1, ew2, eb2, ewmu, ebmu, ewlv, eblv,
     dw1, db1, dw2, db2, dw3, db3) = params

    lv_off = _round_up(latent_dim, 128)
    h2 = ewmu.shape[0]
    ewh = jnp.zeros((h2, 2 * lv_off), jnp.float32)
    ewh = ewh.at[:, :latent_dim].set(ewmu)
    ewh = ewh.at[:, lv_off:lv_off + latent_dim].set(ewlv)
    ebh = jnp.zeros((1, 2 * lv_off), jnp.float32)
    ebh = ebh.at[:, :latent_dim].set(ebmu)
    ebh = ebh.at[:, lv_off:lv_off + latent_dim].set(eblv)

    bf = jnp.bfloat16
    return (ew1.astype(bf), eb1, ew2.astype(bf), eb2, ewh.astype(bf), ebh,
            dw1.astype(bf), db1, dw2.astype(bf), db2, dw3.astype(bf), db3)


# ----------------------------------------------------------------------------
# Forward wrapper
# ----------------------------------------------------------------------------
def mini_vae_forward(x, eps, prepared, *, tile_b=1024):
    """x: (B, input_dim) in [0,1]; eps: (B, latent_dim) ~ N(0,1);
    prepared: output of prepare_params()."""
    B, input_dim = x.shape
    latent_dim = eps.shape[1]
    lv_off = _round_up(latent_dim, 128)

    # -- batch tiling: big tiles feed the MXU, but always >= 2 grid steps so the
    #    "parallel" batch axis can shard across v7x's two TensorCores.
    tb = min(tile_b, _round_up(_cdiv(B, 2), 8))
    tb = max(tb, 8)
    padded_b = _round_up(B, tb)
    if padded_b != B:
        x_p = jnp.pad(x, ((0, padded_b - B), (0, 0)))
        eps_p = jnp.pad(eps, ((0, padded_b - B), (0, 0)))
    else:
        x_p, eps_p = x, eps
    num_tiles = padded_b // tb

    # -- VMEM budget co-tuned with the tile: double-buffered I/O tiles + resident
    #    weights + ~8 KB/row of f32 intermediates; clamp to [32, 48] MiB.
    w_bytes = sum(int(w.size) * w.dtype.itemsize for w in prepared)
    io_bytes = tb * 4 * (input_dim + latent_dim + input_dim)      # x, eps, x_hat
    vmem_est = 2 * w_bytes + 2 * io_bytes + tb * 8 * 1024
    vmem_limit = max(32 << 20, min(48 << 20, int(1.5 * vmem_est)))

    def const_spec(arr):  # full-array block, constant index -> VMEM resident
        return pl.BlockSpec(arr.shape, lambda i: (0, 0))

    kernel = functools.partial(
        _vae_forward_kernel,
        latent_dim=latent_dim, lv_off=lv_off, batch=B, tile_b=tb)

    operands = (x_p, eps_p) + tuple(prepared)

    in_specs = [
        pl.BlockSpec((tb, input_dim), lambda i: (i, 0)),     # x tile (pipelined)
        pl.BlockSpec((tb, latent_dim), lambda i: (i, 0)),    # eps tile (pipelined)
    ] + [const_spec(w) for w in prepared]                    # resident weights / biases

    x_hat_p, loss_parts = pl.pallas_call(
        kernel,
        grid=(num_tiles,),
        out_shape=(
            jax.ShapeDtypeStruct((padded_b, input_dim), jnp.float32),
            jax.ShapeDtypeStruct((num_tiles, 1, 1), jnp.float32),
        ),
        in_specs=in_specs,
        out_specs=(
            pl.BlockSpec((tb, input_dim), lambda i: (i, 0)),
            pl.BlockSpec((1, 1, 1), lambda i: (i, 0, 0)),
        ),
        compiler_params=pltpu.CompilerParams(
            dimension_semantics=("parallel",),          # shards across v7x's 2 TCs
            vmem_limit_bytes=vmem_limit,
        ),
    )(*operands)

    return x_hat_p[:B], jnp.sum(loss_parts)


# ----------------------------------------------------------------------------
# Pure-JAX f32 reference (for the sanity check) + deterministic init
# ----------------------------------------------------------------------------
def mini_vae_reference(x, eps, params):
    (ew1, eb1, ew2, eb2, ewmu, ebmu, ewlv, eblv,
     dw1, db1, dw2, db2, dw3, db3) = params
    relu = jax.nn.relu
    h = relu(x @ ew1 + eb1)
    h = relu(h @ ew2 + eb2)
    mu = h @ ewmu + ebmu
    logvar = h @ ewlv + eblv
    z = mu + jnp.exp(0.5 * logvar) * eps
    d = relu(z @ dw1 + db1)
    d = relu(d @ dw2 + db2)
    logits = d @ dw3 + db3
    x_hat = jax.nn.sigmoid(logits)
    bce = jnp.sum(jnp.maximum(logits, 0.0) - x * logits
                  + jnp.log1p(jnp.exp(-jnp.abs(logits))))
    kld = -0.5 * jnp.sum(1.0 + logvar - mu * mu - jnp.exp(logvar))
    return x_hat, bce + kld


def init_params(key, input_dim, latent_dim, enc_widths=(128, 256), dec_widths=(128, 256)):
    """Deterministic glorot-ish init. Biases stored as (1, out) rows."""
    def linear(k, fan_in, fan_out):
        kw, _ = jax.random.split(k)
        scale = jnp.sqrt(2.0 / (fan_in + fan_out)).astype(jnp.float32)
        w = jax.random.normal(kw, (fan_in, fan_out), jnp.float32) * scale
        b = jnp.zeros((1, fan_out), jnp.float32)
        return w, b

    keys = jax.random.split(key, 7)
    h1, h2 = enc_widths
    g1, g2 = dec_widths
    ew1, eb1 = linear(keys[0], input_dim, h1)
    ew2, eb2 = linear(keys[1], h1, h2)
    ewmu, ebmu = linear(keys[2], h2, latent_dim)
    ewlv, eblv = linear(keys[3], h2, latent_dim)
    dw1, db1 = linear(keys[4], latent_dim, g1)
    dw2, db2 = linear(keys[5], g1, g2)
    dw3, db3 = linear(keys[6], g2, input_dim)
    return (ew1, eb1, ew2, eb2, ewmu, ebmu, ewlv, eblv,
            dw1, db1, dw2, db2, dw3, db3)


if __name__ == "__main__":
    B = 40            # not a multiple of the tile -> exercises the pad + mask path
    INPUT_DIM = 128   # lane-dense x / x_hat output (multiple of 128)
    LATENT_DIM = 16

    root = jax.random.PRNGKey(0)
    k_params, k_x, k_eps = jax.random.split(root, 3)

    params = init_params(k_params, INPUT_DIM, LATENT_DIM)
    prepared = prepare_params(params, LATENT_DIM)   # one-time head fusion + bf16 casts
    x = jax.random.uniform(k_x, (B, INPUT_DIM), jnp.float32)      # BCE target in [0, 1]
    eps = jax.random.normal(k_eps, (B, LATENT_DIM), jnp.float32)  # N(0,1) noise (torch.randn_like)

    fwd = jax.jit(mini_vae_forward)   # default tile_b=1024; tb auto-capped by batch
    x_hat, loss = fwd(x, eps, prepared)
    jax.block_until_ready((x_hat, loss))

    # sanity check vs. pure-JAX f32 reference
    # (kernel uses bf16 MXU inputs + approx-reciprocal sigmoid -> loose tolerance)
    x_hat_want, loss_want = mini_vae_reference(x, eps, params)
    assert x_hat.shape == (B, INPUT_DIM)
    assert jnp.isfinite(loss)
    assert float(jnp.max(jnp.abs(x_hat - x_hat_want))) < 0.05, "x_hat mismatch"
    assert abs(float(loss) - float(loss_want)) / abs(float(loss_want)) < 0.05, "loss mismatch"
    print("KERNEL_OK")
</pallas_src>

<mosaic_0001>
module attributes {stable_mosaic.version = 11 : i64} {
  func.func @_vae_forward_kernel(%arg0: i32, %arg1: memref<24x128xf32, #tpu.memory_space<vmem>>, %arg2: memref<24x16xf32, #tpu.memory_space<vmem>>, %arg3: memref<128x128xbf16, #tpu.memory_space<vmem>>, %arg4: memref<1x128xf32, #tpu.memory_space<vmem>>, %arg5: memref<128x256xbf16, #tpu.memory_space<vmem>>, %arg6: memref<1x256xf32, #tpu.memory_space<vmem>>, %arg7: memref<256x256xbf16, #tpu.memory_space<vmem>>, %arg8: memref<1x256xf32, #tpu.memory_space<vmem>>, %arg9: memref<16x128xbf16, #tpu.memory_space<vmem>>, %arg10: memref<1x128xf32, #tpu.memory_space<vmem>>, %arg11: memref<128x256xbf16, #tpu.memory_space<vmem>>, %arg12: memref<1x256xf32, #tpu.memory_space<vmem>>, %arg13: memref<256x128xbf16, #tpu.memory_space<vmem>>, %arg14: memref<1x128xf32, #tpu.memory_space<vmem>>, %arg15: memref<24x128xf32, #tpu.memory_space<vmem>>, %arg16: memref<1x1x1xf32, #tpu.memory_space<vmem>>) attributes {dimension_semantics = [#tpu.dimension_semantics<parallel>], iteration_bounds = array<i64: 2>, scalar_prefetch = 0 : i64, scratch_operands = 0 : i64, tpu.core_type = #tpu.core_type<tc>, window_params = [{transform_indices = @transform_0, window_bounds = array<i64: 24, 128>}, {transform_indices = @transform_1, window_bounds = array<i64: 24, 16>}, {pipeline_mode = #tpu.pipeline_mode<synchronous>, transform_indices = @transform_2, window_bounds = array<i64: 128, 128>}, {pipeline_mode = #tpu.pipeline_mode<synchronous>, transform_indices = @transform_3, window_bounds = array<i64: 1, 128>}, {pipeline_mode = #tpu.pipeline_mode<synchronous>, transform_indices = @transform_4, window_bounds = array<i64: 128, 256>}, {pipeline_mode = #tpu.pipeline_mode<synchronous>, transform_indices = @transform_5, window_bounds = array<i64: 1, 256>}, {pipeline_mode = #tpu.pipeline_mode<synchronous>, transform_indices = @transform_6, window_bounds = array<i64: 256, 256>}, {pipeline_mode = #tpu.pipeline_mode<synchronous>, transform_indices = @transform_7, window_bounds = array<i64: 1, 256>}, {pipeline_mode = #tpu.pipeline_mode<synchronous>, transform_indices = @transform_8, window_bounds = array<i64: 16, 128>}, {pipeline_mode = #tpu.pipeline_mode<synchronous>, transform_indices = @transform_9, window_bounds = array<i64: 1, 128>}, {pipeline_mode = #tpu.pipeline_mode<synchronous>, transform_indices = @transform_10, window_bounds = array<i64: 128, 256>}, {pipeline_mode = #tpu.pipeline_mode<synchronous>, transform_indices = @transform_11, window_bounds = array<i64: 1, 256>}, {pipeline_mode = #tpu.pipeline_mode<synchronous>, transform_indices = @transform_12, window_bounds = array<i64: 256, 128>}, {pipeline_mode = #tpu.pipeline_mode<synchronous>, transform_indices = @transform_13, window_bounds = array<i64: 1, 128>}, {transform_indices = @transform_14, window_bounds = array<i64: 24, 128>}, {transform_indices = @transform_15, window_bounds = array<i64: 1, 1, 1>}]} {
    %c0 = arith.constant 0 : index
    %c0_0 = arith.constant 0 : index
    %0 = vector.load %arg1[%c0, %c0_0] : memref<24x128xf32, #tpu.memory_space<vmem>>, vector<24x128xf32>
    %c24_i32 = arith.constant 24 : i32
    %1 = arith.muli %arg0, %c24_i32 : i32
    %2 = tpu.iota {dimensions = array<i32: 0>} : vector<24x1xi32>
    %3 = vector.broadcast %1 : i32 to vector<24x1xi32>
    %4 = arith.addi %3, %2 : vector<24x1xi32>
    %c40_i32 = arith.constant 40 : i32
    %5 = vector.broadcast %c40_i32 : i32 to vector<24x1xi32>
    %6 = arith.cmpi slt, %4, %5 : vector<24x1xi32>
    %7 = arith.extui %6 : vector<24x1xi1> to vector<24x1xi32>
    %8 = arith.sitofp %7 : vector<24x1xi32> to vector<24x1xf32>
    %9 = arith.truncf %0 : vector<24x128xf32> to vector<24x128xbf16>
    %c0_1 = arith.constant 0 : index
    %c0_2 = arith.constant 0 : index
    %10 = vector.load %arg3[%c0_1, %c0_2] : memref<128x128xbf16, #tpu.memory_space<vmem>>, vector<128x128xbf16>
    %cst = arith.constant dense<0.000000e+00> : vector<24x128xf32>
    %11 = tpu.matmul %9, %10, %cst {dimension_numbers = #tpu.dot_dimension_numbers<[1], [0], [0], [1], [0, 0, 1, 1], [], []>} : vector<24x128xbf16>, vector<128x128xbf16>, vector<24x128xf32> -> vector<24x128xf32>
    %c0_3 = arith.constant 0 : index
    %c0_4 = arith.constant 0 : index
    %12 = vector.load %arg4[%c0_3, %c0_4] : memref<1x128xf32, #tpu.memory_space<vmem>>, vector<1x128xf32>
    %13 = vector.broadcast %12 : vector<1x128xf32> to vector<24x128xf32>
    %14 = arith.addf %11, %13 : vector<24x128xf32>
    %cst_5 = arith.constant 0.000000e+00 : f32
    %15 = vector.broadcast %cst_5 : f32 to vector<24x128xf32>
    %16 = arith.maximumf %14, %15 : vector<24x128xf32>
    %17 = arith.truncf %16 : vector<24x128xf32> to vector<24x128xbf16>
    %c0_6 = arith.constant 0 : index
    %c0_7 = arith.constant 0 : index
    %18 = vector.load %arg5[%c0_6, %c0_7] : memref<128x256xbf16, #tpu.memory_space<vmem>>, vector<128x256xbf16>
    %cst_8 = arith.constant dense<0.000000e+00> : vector<24x256xf32>
    %19 = tpu.matmul %17, %18, %cst_8 {dimension_numbers = #tpu.dot_dimension_numbers<[1], [0], [0], [1], [0, 0, 1, 1], [], []>} : vector<24x128xbf16>, vector<128x256xbf16>, vector<24x256xf32> -> vector<24x256xf32>
    %c0_9 = arith.constant 0 : index
    %c0_10 = arith.constant 0 : index
    %20 = vector.load %arg6[%c0_9, %c0_10] : memref<1x256xf32, #tpu.memory_space<vmem>>, vector<1x256xf32>
    %21 = vector.broadcast %20 : vector<1x256xf32> to vector<24x256xf32>
    %22 = arith.addf %19, %21 : vector<24x256xf32>
    %cst_11 = arith.constant 0.000000e+00 : f32
    %23 = vector.broadcast %cst_11 : f32 to vector<24x256xf32>
    %24 = arith.maximumf %22, %23 : vector<24x256xf32>
    %25 = arith.truncf %24 : vector<24x256xf32> to vector<24x256xbf16>
    %c0_12 = arith.constant 0 : index
    %c0_13 = arith.constant 0 : index
    %26 = vector.load %arg7[%c0_12, %c0_13] : memref<256x256xbf16, #tpu.memory_space<vmem>>, vector<256x256xbf16>
    %cst_14 = arith.constant dense<0.000000e+00> : vector<24x256xf32>
    %27 = tpu.matmul %25, %26, %cst_14 {dimension_numbers = #tpu.dot_dimension_numbers<[1], [0], [0], [1], [0, 0, 1, 1], [], []>} : vector<24x256xbf16>, vector<256x256xbf16>, vector<24x256xf32> -> vector<24x256xf32>
    %c0_15 = arith.constant 0 : index
    %c0_16 = arith.constant 0 : index
    %28 = vector.load %arg8[%c0_15, %c0_16] : memref<1x256xf32, #tpu.memory_space<vmem>>, vector<1x256xf32>
    %29 = vector.broadcast %28 : vector<1x256xf32> to vector<24x256xf32>
    %30 = arith.addf %27, %29 : vector<24x256xf32>
    %31 = vector.extract_strided_slice %30 {offsets = [0, 0], sizes = [24, 16], strides = [1, 1]} : vector<24x256xf32> to vector<24x16xf32>
    %32 = vector.extract_strided_slice %30 {offsets = [0, 128], sizes = [24, 16], strides = [1, 1]} : vector<24x256xf32> to vector<24x16xf32>
    %cst_17 = arith.constant 5.000000e-01 : f32
    %33 = vector.broadcast %cst_17 : f32 to vector<24x16xf32>
    %34 = arith.mulf %33, %32 : vector<24x16xf32>
    %35 = math.exp %34 : vector<24x16xf32>
    %c0_18 = arith.constant 0 : index
    %c0_19 = arith.constant 0 : index
    %36 = vector.load %arg2[%c0_18, %c0_19] : memref<24x16xf32, #tpu.memory_space<vmem>>, vector<24x16xf32>
    %37 = arith.mulf %35, %36 : vector<24x16xf32>
    %38 = arith.addf %31, %37 : vector<24x16xf32>
    %39 = arith.truncf %38 : vector<24x16xf32> to vector<24x16xbf16>
    %c0_20 = arith.constant 0 : index
    %c0_21 = arith.constant 0 : index
    %40 = vector.load %arg9[%c0_20, %c0_21] : memref<16x128xbf16, #tpu.memory_space<vmem>>, vector<16x128xbf16>
    %cst_22 = arith.constant dense<0.000000e+00> : vector<24x128xf32>
    %41 = tpu.matmul %39, %40, %cst_22 {dimension_numbers = #tpu.dot_dimension_numbers<[1], [0], [0], [1], [0, 0, 1, 1], [], []>} : vector<24x16xbf16>, vector<16x128xbf16>, vector<24x128xf32> -> vector<24x128xf32>
    %c0_23 = arith.constant 0 : index
    %c0_24 = arith.constant 0 : index
    %42 = vector.load %arg10[%c0_23, %c0_24] : memref<1x128xf32, #tpu.memory_space<vmem>>, vector<1x128xf32>
    %43 = vector.broadcast %42 : vector<1x128xf32> to vector<24x128xf32>
    %44 = arith.addf %41, %43 : vector<24x128xf32>
    %cst_25 = arith.constant 0.000000e+00 : f32
    %45 = vector.broadcast %cst_25 : f32 to vector<24x128xf32>
    %46 = arith.maximumf %44, %45 : vector<24x128xf32>
    %47 = arith.truncf %46 : vector<24x128xf32> to vector<24x128xbf16>
    %c0_26 = arith.constant 0 : index
    %c0_27 = arith.constant 0 : index
    %48 = vector.load %arg11[%c0_26, %c0_27] : memref<128x256xbf16, #tpu.memory_space<vmem>>, vector<128x256xbf16>
    %cst_28 = arith.constant dense<0.000000e+00> : vector<24x256xf32>
    %49 = tpu.matmul %47, %48, %cst_28 {dimension_numbers = #tpu.dot_dimension_numbers<[1], [0], [0], [1], [0, 0, 1, 1], [], []>} : vector<24x128xbf16>, vector<128x256xbf16>, vector<24x256xf32> -> vector<24x256xf32>
    %c0_29 = arith.constant 0 : index
    %c0_30 = arith.constant 0 : index
    %50 = vector.load %arg12[%c0_29, %c0_30] : memref<1x256xf32, #tpu.memory_space<vmem>>, vector<1x256xf32>
    %51 = vector.broadcast %50 : vector<1x256xf32> to vector<24x256xf32>
    %52 = arith.addf %49, %51 : vector<24x256xf32>
    %cst_31 = arith.constant 0.000000e+00 : f32
    %53 = vector.broadcast %cst_31 : f32 to vector<24x256xf32>
    %54 = arith.maximumf %52, %53 : vector<24x256xf32>
    %55 = arith.truncf %54 : vector<24x256xf32> to vector<24x256xbf16>
    %c0_32 = arith.constant 0 : index
    %c0_33 = arith.constant 0 : index
    %56 = vector.load %arg13[%c0_32, %c0_33] : memref<256x128xbf16, #tpu.memory_space<vmem>>, vector<256x128xbf16>
    %cst_34 = arith.constant dense<0.000000e+00> : vector<24x128xf32>
    %57 = tpu.matmul %55, %56, %cst_34 {dimension_numbers = #tpu.dot_dimension_numbers<[1], [0], [0], [1], [0, 0, 1, 1], [], []>} : vector<24x256xbf16>, vector<256x128xbf16>, vector<24x128xf32> -> vector<24x128xf32>
    %c0_35 = arith.constant 0 : index
    %c0_36 = arith.constant 0 : index
    %58 = vector.load %arg14[%c0_35, %c0_36] : memref<1x128xf32, #tpu.memory_space<vmem>>, vector<1x128xf32>
    %59 = vector.broadcast %58 : vector<1x128xf32> to vector<24x128xf32>
    %60 = arith.addf %57, %59 : vector<24x128xf32>
    %61 = math.absf %60 : vector<24x128xf32>
    %cst_37 = arith.constant 0.000000e+00 : f32
    %62 = vector.broadcast %cst_37 : f32 to vector<24x128xf32>
    %63 = arith.subf %62, %61 : vector<24x128xf32>
    %64 = math.exp %63 : vector<24x128xf32>
    %cst_38 = arith.constant 1.000000e+00 : f32
    %65 = vector.broadcast %cst_38 : f32 to vector<24x128xf32>
    %66 = arith.addf %65, %64 : vector<24x128xf32>
    %67 = tpu.reciprocal %66 {approx = true} : vector<24x128xf32> -> vector<24x128xf32>
    %cst_39 = arith.constant 0.000000e+00 : f32
    %68 = vector.broadcast %cst_39 : f32 to vector<24x128xf32>
    %69 = arith.cmpf oge, %60, %68 : vector<24x128xf32>
    %70 = arith.mulf %64, %67 : vector<24x128xf32>
    %71 = arith.select %69, %67, %70 : vector<24x128xi1>, vector<24x128xf32>
    %c0_40 = arith.constant 0 : index
    %c0_41 = arith.constant 0 : index
    %72 = vector.load %arg15[%c0_40, %c0_41] : memref<24x128xf32, #tpu.memory_space<vmem>>, vector<24x128xf32>
    tpu.vector_store %arg15[%c0_40, %c0_41], %71 {strides = array<i32>} : memref<24x128xf32, #tpu.memory_space<vmem>>, vector<24x128xf32>,
    %cst_42 = arith.constant 0.000000e+00 : f32
    %73 = vector.broadcast %cst_42 : f32 to vector<24x128xf32>
    %74 = arith.maximumf %60, %73 : vector<24x128xf32>
    %75 = arith.mulf %0, %60 : vector<24x128xf32>
    %76 = arith.subf %74, %75 : vector<24x128xf32>
    %77 = math.log1p %64 : vector<24x128xf32>
    %78 = arith.addf %76, %77 : vector<24x128xf32>
    %cst_43 = arith.constant dense<0.000000e+00> : vector<24xf32>
    %79 = vector.multi_reduction <add>, %78, %cst_43 [1] : vector<24x128xf32> to vector<24xf32>
    %80 = vector.shape_cast %79 : vector<24xf32> to vector<24x1xf32>
    %cst_44 = arith.constant 1.000000e+00 : f32
    %81 = vector.broadcast %cst_44 : f32 to vector<24x16xf32>
    %82 = arith.addf %81, %32 : vector<24x16xf32>
    %83 = arith.mulf %31, %31 : vector<24x16xf32>
    %84 = arith.subf %82, %83 : vector<24x16xf32>
    %85 = arith.mulf %35, %35 : vector<24x16xf32>
    %86 = arith.subf %84, %85 : vector<24x16xf32>
    %cst_45 = arith.constant dense<0.000000e+00> : vector<24xf32>
    %87 = vector.multi_reduction <add>, %86, %cst_45 [1] : vector<24x16xf32> to vector<24xf32>
    %88 = vector.shape_cast %87 : vector<24xf32> to vector<24x1xf32>
    %cst_46 = arith.constant -5.000000e-01 : f32
    %89 = vector.broadcast %cst_46 : f32 to vector<24x1xf32>
    %90 = arith.mulf %89, %88 : vector<24x1xf32>
    %91 = arith.addf %80, %90 : vector<24x1xf32>
    %92 = arith.mulf %8, %91 : vector<24x1xf32>
    %93 = vector.shape_cast %92 : vector<24x1xf32> to vector<1x24x1xf32>
    %cst_47 = arith.constant dense<0.000000e+00> : vector<1xf32>
    %94 = vector.multi_reduction <add>, %93, %cst_47 [1, 2] : vector<1x24x1xf32> to vector<1xf32>
    %95 = vector.shape_cast %94 : vector<1xf32> to vector<1x1x1xf32>
    %96 = vector.extract %95[0, 0, 0] : f32 from vector<1x1x1xf32>
    %97 = vector.broadcast %96 : f32 to vector<1x1xf32>
    %c0_48 = arith.constant 0 : index
    %c0_49 = arith.constant 0 : index
    %c0_50 = arith.constant 0 : index
    %98 = vector.load %arg16[%c0_48, %c0_49, %c0_50] : memref<1x1x1xf32, #tpu.memory_space<vmem>>, vector<1x1x1xf32>
    %99 = vector.shape_cast %98 : vector<1x1x1xf32> to vector<1x1xf32>
    %100 = vector.shape_cast %97 : vector<1x1xf32> to vector<1x1x1xf32>
    tpu.vector_store %arg16[%c0_48, %c0_49, %c0_50], %100 {strides = array<i32>} : memref<1x1x1xf32, #tpu.memory_space<vmem>>, vector<1x1x1xf32>,
    return
  }
  func.func @transform_0(%arg0: i32) -> (i32, i32) {
    %c0_i32 = arith.constant 0 : i32
    %c0_i32_0 = arith.constant 0 : i32
    return %arg0, %c0_i32 : i32, i32
  }
  func.func @transform_1(%arg0: i32) -> (i32, i32) {
    %c0_i32 = arith.constant 0 : i32
    %c0_i32_0 = arith.constant 0 : i32
    return %arg0, %c0_i32 : i32, i32
  }
  func.func @transform_2(%arg0: i32) -> (i32, i32) {
    %c0_i32 = arith.constant 0 : i32
    %c0_i32_0 = arith.constant 0 : i32
    %c0_i32_1 = arith.constant 0 : i32
    return %c0_i32, %c0_i32_0 : i32, i32
  }
  func.func @transform_3(%arg0: i32) -> (i32, i32) {
    %c0_i32 = arith.constant 0 : i32
    %c0_i32_0 = arith.constant 0 : i32
    %c0_i32_1 = arith.constant 0 : i32
    return %c0_i32, %c0_i32_0 : i32, i32
  }
  func.func @transform_4(%arg0: i32) -> (i32, i32) {
    %c0_i32 = arith.constant 0 : i32
    %c0_i32_0 = arith.constant 0 : i32
    %c0_i32_1 = arith.constant 0 : i32
    return %c0_i32, %c0_i32_0 : i32, i32
  }
  func.func @transform_5(%arg0: i32) -> (i32, i32) {
    %c0_i32 = arith.constant 0 : i32
    %c0_i32_0 = arith.constant 0 : i32
    %c0_i32_1 = arith.constant 0 : i32
    return %c0_i32, %c0_i32_0 : i32, i32
  }
  func.func @transform_6(%arg0: i32) -> (i32, i32) {
    %c0_i32 = arith.constant 0 : i32
    %c0_i32_0 = arith.constant 0 : i32
    %c0_i32_1 = arith.constant 0 : i32
    return %c0_i32, %c0_i32_0 : i32, i32
  }
  func.func @transform_7(%arg0: i32) -> (i32, i32) {
    %c0_i32 = arith.constant 0 : i32
    %c0_i32_0 = arith.constant 0 : i32
    %c0_i32_1 = arith.constant 0 : i32
    return %c0_i32, %c0_i32_0 : i32, i32
  }
  func.func @transform_8(%arg0: i32) -> (i32, i32) {
    %c0_i32 = arith.constant 0 : i32
    %c0_i32_0 = arith.constant 0 : i32
    %c0_i32_1 = arith.constant 0 : i32
    return %c0_i32, %c0_i32_0 : i32, i32
  }
  func.func @transform_9(%arg0: i32) -> (i32, i32) {
    %c0_i32 = arith.constant 0 : i32
    %c0_i32_0 = arith.constant 0 : i32
    %c0_i32_1 = arith.constant 0 : i32
    return %c0_i32, %c0_i32_0 : i32, i32
  }
  func.func @transform_10(%arg0: i32) -> (i32, i32) {
    %c0_i32 = arith.constant 0 : i32
    %c0_i32_0 = arith.constant 0 : i32
    %c0_i32_1 = arith.constant 0 : i32
    return %c0_i32, %c0_i32_0 : i32, i32
  }
  func.func @transform_11(%arg0: i32) -> (i32, i32) {
    %c0_i32 = arith.constant 0 : i32
    %c0_i32_0 = arith.constant 0 : i32
    %c0_i32_1 = arith.constant 0 : i32
    return %c0_i32, %c0_i32_0 : i32, i32
  }
  func.func @transform_12(%arg0: i32) -> (i32, i32) {
    %c0_i32 = arith.constant 0 : i32
    %c0_i32_0 = arith.constant 0 : i32
    %c0_i32_1 = arith.constant 0 : i32
    return %c0_i32, %c0_i32_0 : i32, i32
  }
  func.func @transform_13(%arg0: i32) -> (i32, i32) {
    %c0_i32 = arith.constant 0 : i32
    %c0_i32_0 = arith.constant 0 : i32
    %c0_i32_1 = arith.constant 0 : i32
    return %c0_i32, %c0_i32_0 : i32, i32
  }
  func.func @transform_14(%arg0: i32) -> (i32, i32) {
    %c0_i32 = arith.constant 0 : i32
    %c0_i32_0 = arith.constant 0 : i32
    return %arg0, %c0_i32 : i32, i32
  }
  func.func @transform_15(%arg0: i32) -> (i32, i32, i32) {
    %c0_i32 = arith.constant 0 : i32
    %c0_i32_0 = arith.constant 0 : i32
    %c0_i32_1 = arith.constant 0 : i32
    return %arg0, %c0_i32, %c0_i32_0 : i32, i32, i32
  }
}

</mosaic_0001>

<bundles_post_ra>
// kernel: mini_vae_forward.1
= control target key start
LH: loop header
LB: loop body
LE: loop exit
PB: predicated region body
PF: predicated region fallthrough
CT: control target
= control target key end

     0   :  { %s3068_s0 = inlined_call_operand.vmem [shape: f32[48,128], index: 0, kind: input, shape index: {}]   ;;  %s3069_s1 = inlined_call_operand.vmem [shape: f32[48,16], index: 1, kind: input, shape index: {}]   ;;  %s3070_s2 = inlined_call_operand.hbm [shape: bf16[128,128], index: 2, kind: input, shape index: {}]   ;;  %s3071_s3 = inlined_call_operand.hbm [shape: f32[1,128], index: 3, kind: input, shape index: {}]   ;;  %s3072_s4 = inlined_call_operand.hbm [shape: bf16[128,256], index: 4, kind: input, shape index: {}]   ;;  %s3073_s5 = inlined_call_operand.hbm [shape: f32[1,256], index: 5, kind: input, shape index: {}]   ;;  %s3074_s6 = inlined_call_operand.vmem [shape: bf16[256,256], index: 6, kind: input, shape index: {}]   ;;  %s3075_s7 = inlined_call_operand.hbm [shape: f32[1,256], index: 7, kind: input, shape index: {}]   ;;  %s3076_s8 = inlined_call_operand.vmem [shape: bf16[16,128], index: 8, kind: input, shape index: {}]   ;;  %s3077_s9 = inlined_call_operand.vmem [shape: f32[1,128], index: 9, kind: input, shape index: {}]   ;;  %s3078_s10 = inlined_call_operand.hbm [shape: bf16[128,256], index: 10, kind: input, shape index: {}]   ;;  %s3079_s11 = inlined_call_operand.vmem [shape: f32[1,256], index: 11, kind: input, shape index: {}]   ;;  %s3080_s12 = inlined_call_operand.hbm [shape: bf16[256,128], index: 12, kind: input, shape index: {}]   ;;  %s3081_s13 = inlined_call_operand.vmem [shape: f32[1,128], index: 13, kind: input, shape index: {}]   ;;  %s3082_s14 = inlined_call_operand.vmem [shape: f32[48,128], index: 14, kind: output, shape index: {0}]   ;;  %s3083_s15 = inlined_call_operand.vmem [shape: f32[2,1,1], index: 15, kind: output, shape index: {1}]  }
   0x1   :  { %3089 = sst [smem:[#allocation18_spill]] %s3071_s3 }
   0x2   :  { %3090 = sst [smem:[#allocation19_spill]] %s3073_s5 }
   0x3   :  { %3091 = sst [smem:[#allocation20_spill]] %s3078_s10 }
   0x4   :  { %3092 = sst [smem:[#allocation21_spill]] %s3082_s14 }
   0x5   :  { %3093 = sst [smem:[#allocation22_spill]] %s3083_s15 }
   0x6   :  { %21 = vsyncpa [#allocation3], 0 }
   0x7   :  { %22 = vsyncpa [#allocation5], 0 }
   0x8   :  { %23 = vsyncpa [#allocation8], 0 }
   0x9   :  { %24 = vsyncpa [#allocation11], 0  ;;  %s2665_s18 = smov 0  }
   0xa LB: > { %3094 = sst [smem:[#allocation17_spill]] %s2570_s18  ;;  %s2572_s19 = smov [#allocation4]   ;;  %s2570_s18 = sphi %s2665_s18, %s30_s18  }
   0xb   : > { %s417_s20 = sshll.u32 %s2572_s19, 4  ;;  %s2671_s21 = sadd.s32 4294967295, %s2570_s18   ;;  %s2676_s20 = int_to_ptr.vmem [resolvable:$true] %s417_s20 }
   0xc   : > { %p1934_p0 = scmp.ge.s32.totalorder %s2570_s18, 1  ;;  %p391_p1 = scmp.lt.s32.totalorder %s2570_s18, 3 }
   0xd   : > { %p3085_p2 = scmp.eq.s32.totalorder %s2671_s21, 0  ;;  %s2573_s23 = smov [#allocation7]  }
   0xe   : > { %p2678_p3 = pnand %p1934_p0, %p391_p1  ;;  %s441_s24 = sshll.u32 %s2573_s23, 4  ;;  %s2684_s24 = int_to_ptr.vmem [resolvable:$true] %s441_s24 }
   0xf   : > { %s2574_s26 = smov [#allocation10]   ;;  %s2575_s28 = smov [#allocation2]  }
  0x10   : > { %s3095_s22 = scalar_select %p2678_p3, 1, 0 }
  0x11   : > { %p2150_p4 = pneg %p2678_p3  ;;  %s471_s27 = sshll.u32 %s2574_s26, 4  ;;  %s2692_s27 = int_to_ptr.vmem [resolvable:$true] %s471_s27 }
  0x12   : > { %s2694_s29 = sshll.u32 %s2575_s28, 4  ;;  %s3097_s3 = sld [smem:[#allocation18_spill]]  ;;  %s404_s29 = int_to_ptr.vmem [resolvable:$true] %s2694_s29 }
  0x13   : > { %p2688_p5 = pnand %p3085_p2, %p2150_p4 }
  0x15   : > { %p2704_p7 = pneg %p2688_p5 }
  0x18   : > { %s2352_s17 = scalar_lea.hbm %s3097_s3, 16 }
  0x19   : > { %p2353_p6 = scmp.ne.s32.totalorder %s3097_s3, %s2352_s17  ;;  %p2359_p10 = scmp.lt.u32.totalorder %s2352_s17, %s3097_s3 }
  0x1b   : > { %p2355_p8 = pnand %p2704_p7, %p2353_p6 }
  0x1d   : > { %p2356_p9 = pneg %p2355_p8 }
  0x1f   : > { %p2361_p11 = pnand %p2359_p10, %p2356_p9 }
  0x21   : > { %2364 = shalt.err (!%p2361_p11)
}
  0x22   : > { %s2365_s30 = scalar_lea.vmem %s2676_s20, 16  ;;  %s2372_s16 = scalar_lea.vmem %s2676_s20, 32 }
  0x23   : > { %p2366_p12 = scmp.ne.s32.totalorder %s2676_s20, %s2365_s30  ;;  %p2373_p1 = scmp.lt.s32.totalorder %s2676_s20, %s2676_s20 }
  0x24   : > { %p2374_p4 = scmp.lt.s32.totalorder %s2372_s16, %s2365_s30 }
  0x25   : > { %p2368_p13 = pnand %p2366_p12, %p2704_p7 }
  0x26   : > { %p2375_p6 = por %p2374_p4, %p2373_p1 }
  0x27   : > { %p2369_p0 = pneg %p2368_p13 }
  0x29   : > { %p2376_p8 = pnand %p2375_p6, %p2369_p0 }
  0x2b   : > { %2379 = shalt.err (!%p2376_p8)
}
  0x2c   : > { %2156 = dma.hbm_to_vmem [thread:$0]  (!%p2688_p5), %s3097_s3, 16, %s2676_s20, [#allocation5]  }
  0x2d   : > { %s3099_s5 = sld [smem:[#allocation19_spill]] }
  0x33   : > { %s2380_s28 = scalar_lea.hbm %s3099_s5, 32 }
  0x34   : > { %p2381_p9 = scmp.ne.s32.totalorder %s3099_s5, %s2380_s28  ;;  %p2387_p12 = scmp.lt.u32.totalorder %s2380_s28, %s3099_s5 }
  0x36   : > { %p2383_p10 = pnand %p2381_p9, %p2704_p7 }
  0x38   : > { %p2384_p11 = pneg %p2383_p10 }
  0x3a   : > { %p2389_p13 = pnand %p2387_p12, %p2384_p11 }
  0x3c   : > { %2392 = shalt.err (!%p2389_p13)
}
  0x3d   : > { %s2393_s20 = scalar_lea.vmem %s2684_s24, 32  ;;  %p2401_p6 = scmp.lt.s32.totalorder %s2684_s24, %s2684_s24 }
  0x3e   : > { %p2394_p0 = scmp.ne.s32.totalorder %s2684_s24, %s2393_s20  ;;  %p2402_p8 = scmp.lt.s32.totalorder %s2393_s20, %s2393_s20 }
  0x40   : > { %p2396_p1 = pnand %p2394_p0, %p2704_p7  ;;  %p2403_p9 = por %p2402_p8, %p2401_p6 }
  0x42   : > { %p2397_p4 = pneg %p2396_p1 }
  0x44   : > { %p2404_p10 = pnand %p2403_p9, %p2397_p4 }
  0x46   : > { %2407 = shalt.err (!%p2404_p10)
}
  0x47   : > { %2162 = dma.hbm_to_vmem [thread:$0]  (!%p2688_p5), %s3099_s5, 32, %s2684_s24, [#allocation8]  }
  0x48   : > { %s3100_s10 = sld [smem:[#allocation20_spill]] }
  0x4e   : > { %s2408_s23 = scalar_lea.hbm %s3100_s10, 2048 }
  0x4f   : > { %p2409_p11 = scmp.ne.s32.totalorder %s3100_s10, %s2408_s23  ;;  %p2415_p0 = scmp.lt.u32.totalorder %s2408_s23, %s3100_s10 }
  0x51   : > { %p2411_p12 = pnand %p2409_p11, %p2704_p7 }
  0x53   : > { %p2412_p13 = pneg %p2411_p12 }
  0x55   : > { %p2417_p1 = pnand %p2415_p0, %p2412_p13 }
  0x57   : > { %2420 = shalt.err (!%p2417_p1)
}
  0x58   : > { %s2421_s24 = scalar_lea.vmem %s2692_s27, 2048  ;;  %p2429_p9 = scmp.lt.s32.totalorder %s2692_s27, %s2692_s27 }
  0x59   : > { %p2422_p4 = scmp.ne.s32.totalorder %s2692_s27, %s2421_s24  ;;  %p2430_p10 = scmp.lt.s32.totalorder %s2421_s24, %s2421_s24 }
  0x5b   : > { %p2424_p6 = pnand %p2422_p4, %p2704_p7  ;;  %p2431_p11 = por %p2430_p10, %p2429_p9 }
  0x5d   : > { %p2425_p8 = pneg %p2424_p6 }
  0x5f   : > { %p2432_p12 = pnand %p2431_p11, %p2425_p8 }
  0x61   : > { %2435 = shalt.err (!%p2432_p12)
}
  0x62   : > { %s3087_s20 = smov 128   ;;  %s3088_s14 = smov 8  }
  0x63   : > { %2168 = dma.hbm_to_vmem [thread:$0]  (!%p2688_p5), %s3100_s10, 2048, %s2692_s27, [#allocation11], %s3087_s20, %s3087_s20, %s3088_s14  }
  0x64   : > { %s2436_s26 = scalar_lea.hbm %s3070_s2, 1024 }
  0x65   : > { %p2437_p13 = scmp.ne.s32.totalorder %s3070_s2, %s2436_s26  ;;  %p2443_p4 = scmp.lt.u32.totalorder %s2436_s26, %s3070_s2 }
  0x67   : > { %p2439_p0 = pnand %p2437_p13, %p2704_p7 }
  0x69   : > { %p2440_p1 = pneg %p2439_p0 }
  0x6b   : > { %p2445_p6 = pnand %p2443_p4, %p2440_p1 }
  0x6d   : > { %2448 = shalt.err (!%p2445_p6)
}
  0x6e   : > { %s2449_s15 = scalar_lea.vmem %s404_s29, 1024  ;;  %p2457_p11 = scmp.lt.s32.totalorder %s404_s29, %s404_s29 }
  0x6f   : > { %p2450_p8 = scmp.ne.s32.totalorder %s404_s29, %s2449_s15  ;;  %p2458_p12 = scmp.lt.s32.totalorder %s2449_s15, %s2449_s15 }
  0x71   : > { %p2452_p9 = pnand %p2450_p8, %p2704_p7  ;;  %p2459_p2 = por %p2458_p12, %p2457_p11 }
  0x73   : > { %p2453_p10 = pneg %p2452_p9 }
  0x75   : > { %p2460_p3 = pnand %p2459_p2, %p2453_p10 }
  0x77   : > { %2463 = shalt.err (!%p2460_p3)
}
  0x78   : > { %s2578_s27 = smov 64   ;;  %s2579_s17 = smov 4  }
  0x79   : > { %2153 = dma.hbm_to_vmem [thread:$0]  (!%p2688_p5), %s3070_s2, 1024, %s404_s29, [#allocation3], %s2578_s27, %s2578_s27, %s2579_s17  }
  0x7a   : > { %s2580_s26 = smov [#allocation6]   ;;  %s2581_s30 = smov [#allocation9]  }
  0x7b   : > { %s427_s28 = sshll.u32 %s2580_s26, 4  ;;  %s455_s16 = sshll.u32 %s2581_s30, 4  ;;  %s428_s28 = int_to_ptr.vmem [resolvable:$true] %s427_s28  ;;  %s456_s16 = int_to_ptr.vmem [resolvable:$true] %s455_s16 }
  0x7c   : > { %s2464_s20 = scalar_lea.hbm %s3072_s4, 2048 }
  0x7d   : > { %p2465_p2 = scmp.ne.s32.totalorder %s3072_s4, %s2464_s20  ;;  %p2471_p0 = scmp.lt.u32.totalorder %s2464_s20, %s3072_s4 }
  0x7f   : > { %p2467_p3 = pnand %p2465_p2, %p2704_p7 }
  0x81   : > { %p2468_p13 = pneg %p2467_p3 }
  0x83   : > { %p2473_p1 = pnand %p2471_p0, %p2468_p13 }
  0x85   : > { %2476 = shalt.err (!%p2473_p1)
}
  0x86   : > { %s2477_s29 = scalar_lea.vmem %s428_s28, 2048  ;;  %p2485_p9 = scmp.lt.s32.totalorder %s428_s28, %s428_s28 }
  0x87   : > { %p2478_p4 = scmp.ne.s32.totalorder %s428_s28, %s2477_s29  ;;  %p2486_p10 = scmp.lt.s32.totalorder %s2477_s29, %s2477_s29 }
  0x89   : > { %p2480_p6 = pnand %p2478_p4, %p2704_p7  ;;  %p2487_p11 = por %p2486_p10, %p2485_p9 }
  0x8b   : > { %p2481_p8 = pneg %p2480_p6 }
  0x8d   : > { %p2488_p12 = pnand %p2487_p11, %p2481_p8 }
  0x8f   : > { %2491 = shalt.err (!%p2488_p12)
}
  0x90   : > { %s3101_s3 = smov 8   ;;  %s3102_s14 = smov 128  }
  0x91   : > { %2159 = dma.hbm_to_vmem [thread:$0]  (!%p2688_p5), %s3072_s4, 2048, %s428_s28, [#allocation5], %s3102_s14, %s3102_s14, %s3101_s3  }
  0x92   : > { %s2492_s23 = scalar_lea.hbm %s3075_s7, 32 }
  0x93   : > { %p2493_p2 = scmp.ne.s32.totalorder %s3075_s7, %s2492_s23  ;;  %p2499_p0 = scmp.lt.u32.totalorder %s2492_s23, %s3075_s7 }
  0x95   : > { %p2495_p3 = pnand %p2493_p2, %p2704_p7 }
  0x97   : > { %p2496_p13 = pneg %p2495_p3 }
  0x99   : > { %p2501_p1 = pnand %p2499_p0, %p2496_p13 }
  0x9b   : > { %2504 = shalt.err (!%p2501_p1)
}
  0x9c   : > { %s2505_s29 = scalar_lea.vmem %s456_s16, 32  ;;  %p2513_p9 = scmp.lt.s32.totalorder %s456_s16, %s456_s16 }
  0x9d   : > { %p2506_p4 = scmp.ne.s32.totalorder %s456_s16, %s2505_s29  ;;  %p2514_p10 = scmp.lt.s32.totalorder %s2505_s29, %s2505_s29 }
  0x9f   : > { %p2508_p6 = pnand %p2506_p4, %p2704_p7  ;;  %p2515_p11 = por %p2514_p10, %p2513_p9 }
  0xa1   : > { %p2509_p8 = pneg %p2508_p6 }
  0xa3   : > { %p2516_p12 = pnand %p2515_p11, %p2509_p8 }
  0xa5   : > { %2519 = shalt.err (!%p2516_p12)
}
  0xa6   : > { %2165 = dma.hbm_to_vmem [thread:$0]  (!%p2688_p5), %s3075_s7, 32, %s456_s16, [#allocation8]  }
  0xa7   : > { %s2582_s14 = smov [#allocation12]   ;;  %s2520_s19 = scalar_lea.hbm %s3080_s12, 2048 }
  0xa8   : > { %s487_s5 = sshll.u32 %s2582_s14, 4  ;;  %p2521_p2 = scmp.ne.s32.totalorder %s3080_s12, %s2520_s19  ;;  %s488_s5 = int_to_ptr.vmem [resolvable:$true] %s487_s5 }
  0xa9   : > { %p2527_p0 = scmp.lt.u32.totalorder %s2520_s19, %s3080_s12 }
  0xaa   : > { %p2523_p3 = pnand %p2521_p2, %p2704_p7 }
  0xac   : > { %p2524_p13 = pneg %p2523_p3 }
  0xae   : > { %p2529_p1 = pnand %p2527_p0, %p2524_p13 }
  0xb0   : > { %2532 = shalt.err (!%p2529_p1)
}
  0xb1   : > { %s2533_s16 = scalar_lea.vmem %s488_s5, 2048  ;;  %p2541_p9 = scmp.lt.s32.totalorder %s488_s5, %s488_s5 }
  0xb2   : > { %p2534_p4 = scmp.ne.s32.totalorder %s488_s5, %s2533_s16  ;;  %p2542_p10 = scmp.lt.s32.totalorder %s2533_s16, %s2533_s16 }
  0xb4   : > { %p2536_p6 = pnand %p2534_p4, %p2704_p7  ;;  %p2543_p11 = por %p2542_p10, %p2541_p9 }
  0xb6   : > { %p2537_p8 = pneg %p2536_p6 }
  0xb8   : > { %p2544_p12 = pnand %p2543_p11, %p2537_p8 }
  0xba   : > { %2547 = shalt.err (!%p2544_p12)
}
  0xbb   : > { %2171 = dma.hbm_to_vmem [thread:$0]  (!%p2688_p5), %s3080_s12, 2048, %s488_s5, [#allocation11], %s2578_s27, %s2578_s27, %s2579_s17  }
  0xbc   : > { %p3103_p2 = scmp.ne.s32.totalorder %s3095_s22, 0 }
  0xbd   : > { %p3104_p7 = scmp.eq.s32.totalorder (!%p3103_p2), %s2671_s21, 0 }
  0xbe   : > { %524 = sbr.rel (%p3103_p2) target bundleno = 1987 (0x7c3), region = 76 }
  0xc5   : > { %2553 = dma.done.wait (%p3104_p7), [#allocation3], 1024   ;;  %p3105_p3 = pmov %p3104_p7 }
  0xc7   : > { %2555 = vsyncadd (%p3105_p3), [#allocation3], 4294966272  ;;  %p3106_p13 = pmov %p3105_p3 }
  0xc8   : > { %p3107_p0 = pmov %p3105_p3 }
  0xc9   : > { %2557 = dma.done.wait (%p3106_p13), [#allocation5], 2064  }
  0xca   : > { %2559 = vsyncadd (%p3107_p0), [#allocation5], 4294965232  ;;  %p3108_p1 = pmov %p3107_p0 }
  0xcb   : > { %p3109_p5 = pmov %p3107_p0 }
  0xcc   : > { %2561 = dma.done.wait (%p3108_p1), [#allocation8], 64  }
  0xcd   : > { %2563 = vsyncadd (%p3109_p5), [#allocation8], 4294967232  ;;  %p3110_p4 = pmov %p3107_p0 }
  0xce   : > { %p3111_p6 = pmov %p3107_p0 }
  0xcf   : > { %2565 = dma.done.wait (%p3110_p4), [#allocation11], 4096  }
  0xd0   : > { %2567 = vsyncadd (%p3111_p6), [#allocation11], 4294963200  ;;  %s604_s18 = smul.u32 3, %s2671_s21  ;;  %v2207_v0 = vld [vmem:[#allocation2] sm:$0xff]   ;;  %v2208_v1 = vld [vmem:[#allocation2 + $0x8] sm:$0xff]   ;;  %v2583_v29 = vmov 0  }
  0xd1   : > { %2094 = vmatprep.subr.bf16.mxu0 %v2207_v0  ;;  %v2209_v2 = vld [vmem:[#allocation2 + $0x10] sm:$0xff]   ;;  %v2210_v3 = vld [vmem:[#allocation2 + $0x18] sm:$0xff]   ;;  %v2217_v8 = vld [vmem:[#allocation6] ss:$8 sps:$4 sm:$0xff]   ;;  %913 = vmatprep.mubr.bf16.mxu1 %v2583_v29  ;;  %vm1232_vm0 = vcmask 130048   ;;  %s3112_s20 = sld [smem:[#allocation21_spill]] }
  0xd2   : > { %p605_p8 = scmp.lt.s32.totalorder %s604_s18, 5  ;;  %2095 = vmatpush3.bf16.msra.mxu0 %v2207_v0  ;;  %v2215_v7 = vld [vmem:[#allocation6 + $0x4] ss:$8 sps:$4 sm:$0xff]   ;;  %v2218_v10 = vld [vmem:[#allocation6 + $0x14] ss:$8 sps:$4 sm:$0xff]   ;;  %vm1752_vm10 = vcmask 7168  }
  0xd3   : > { %2096 = vmatprep.subr.bf16.mxu0 %v2208_v1  ;;  %v2211_v9 = vld [vmem:[#allocation2 + $0x20] sm:$0xff]   ;;  %881 = vmatprep.subr.bf16.mxu1 %v2215_v7  ;;  %v2220_v11 = vld [vmem:[#allocation6 + $0x10] ss:$8 sps:$4 sm:$0xff]   ;;  %v2212_v13 = vld [vmem:[#allocation2 + $0x28] sm:$0xff]   ;;  %p622_p9 = scmp.lt.s32.totalorder %s2671_s21, 1  ;;  %s3113_s30 = sld [smem:[#allocation22_spill]] }
  0xd4   : > { %s3116_s18 = smov (!%p605_p8, %s604_s18), 5  ;;  %882 = vmatpush1.bf16.msra.mxu1 %v2217_v8  ;;  %v2221_v12 = vld [vmem:[#allocation6 + $0x24] ss:$8 sps:$4 sm:$0xff]   ;;  %v2223_v14 = vld [vmem:[#allocation6 + $0x20] ss:$8 sps:$4 sm:$0xff]   ;;  %v2214_v19 = vld [vmem:[#allocation2 + $0x38] sm:$0xff]  }
  0xd5   : > { %s2876_s22 = sshll.u32 %s3116_s18, 3  ;;  %883 = vmatprep.subr.bf16.mxu1 %v2218_v10  ;;  %v2224_v15 = vld [vmem:[#allocation6 + $0x34] ss:$8 sps:$4 sm:$0xff]   ;;  %v2226_v17 = vld [vmem:[#allocation6 + $0x30] ss:$8 sps:$4 sm:$0xff]   ;;  %vm1768_vm11 = vcmask 0  }
  0xd6   : > { %s2882_s17 = scalar_lea.vmem %s3068_s0, %s2876_s22  ;;  %2097 = vmatpush3.bf16.msra.mxu0 %v2208_v1  ;;  %v2213_v16 = vld [vmem:[#allocation2 + $0x30] sm:$0xff]   ;;  %v2229_v20 = vld [vmem:[#allocation6 + $0x40] ss:$8 sps:$4 sm:$0xff]   ;;  %v1957_v58 = vld [vmem:[#allocation4] ss:$0 sm:$0xff]  ;;  %s614_s18 = scalar_lea.vmem %s3069_s1, %s2876_s22 }
  0xd7   : > { %2098 = vmatprep.subr.bf16.mxu0 %v2209_v2  ;;  %v2885_v4 = vld [vmem:[%s2882_s17] sm:$0xff]  ;;  %v2888_v5 = vld [vmem:[%s2882_s17 + $0x8] sm:$0xff]  ;;  %v2893_v22 = vld [vmem:[%s2882_s17 + $0x10] sm:$0xff]  ;;  %s3044_s19 = scalar_lea.vmem %s3112_s20, %s2876_s22  ;;  %s629_s22 = smul.u32 24, %s2671_s21 }
  0xd8   : > { %v647_v6 = vpack.c.bf16 %v2888_v5, %v2885_v4  ;;  %884 = vmatpush1.bf16.msra.mxu1 %v2220_v11  ;;  %v2227_v18 = vld [vmem:[#allocation6 + $0x44] ss:$8 sps:$4 sm:$0xff]   ;;  %v2230_v21 = vld [vmem:[#allocation6 + $0x54] ss:$8 sps:$4 sm:$0xff]   ;;  %v2232_v23 = vld [vmem:[#allocation6 + $0x50] ss:$8 sps:$4 sm:$0xff]   ;;  %v648_v24 = vpack.c.bf16 %v2893_v22, %v2893_v22 }
  0xd9   : > { %885 = vmatprep.subr.bf16.mxu1 %v2221_v12  ;;  %v2233_v25 = vld [vmem:[#allocation6 + $0x64] ss:$8 sps:$4 sm:$0xff]   ;;  %v2235_v26 = vld [vmem:[#allocation6 + $0x60] ss:$8 sps:$4 sm:$0xff]   ;;  %v2236_v27 = vld [vmem:[#allocation6 + $0x74] ss:$8 sps:$4 sm:$0xff]  }
  0xda   : > { %2099 = vmatpush3.bf16.msra.mxu0 %v2209_v2  ;;  %2110 = vmatprep.mubr.bf16.mxu0 %v647_v6  ;;  %v2238_v28 = vld [vmem:[#allocation6 + $0x70] ss:$8 sps:$4 sm:$0xff]   ;;  %v2239_v30 = vld [vmem:[%s3074_s6] ss:$8 sps:$4 sm:$0xff]   ;;  %v2241_v31 = vld [vmem:[%s3074_s6 + $0x4] ss:$8 sps:$4 sm:$0xff]  }
  0xdb   : > { %2100 = vmatprep.subr.bf16.mxu0 %v2210_v3  ;;  %v2244_v32 = vld [vmem:[%s3074_s6 + $0x14] ss:$8 sps:$4 sm:$0xff]   ;;  %v2242_v33 = vld [vmem:[%s3074_s6 + $0x10] ss:$8 sps:$4 sm:$0xff]   ;;  %v2247_v34 = vld [vmem:[%s3074_s6 + $0x24] ss:$8 sps:$4 sm:$0xff]  }
  0xdc   : > { %886 = vmatpush1.bf16.msra.mxu1 %v2223_v14  ;;  %v2245_v35 = vld [vmem:[%s3074_s6 + $0x20] ss:$8 sps:$4 sm:$0xff]   ;;  %v2250_v36 = vld [vmem:[%s3074_s6 + $0x34] ss:$8 sps:$4 sm:$0xff]   ;;  %v2248_v37 = vld [vmem:[%s3074_s6 + $0x30] ss:$8 sps:$4 sm:$0xff]  }
  0xdd   : > { %887 = vmatprep.subr.bf16.mxu1 %v2224_v15  ;;  %v2253_v38 = vld [vmem:[%s3074_s6 + $0x44] ss:$8 sps:$4 sm:$0xff]   ;;  %v2251_v39 = vld [vmem:[%s3074_s6 + $0x40] ss:$8 sps:$4 sm:$0xff]   ;;  %v2256_v40 = vld [vmem:[%s3074_s6 + $0x54] ss:$8 sps:$4 sm:$0xff]  }
  0xde   : > { %2101 = vmatpush3.bf16.msra.mxu0 %v2210_v3  ;;  %v2254_v41 = vld [vmem:[%s3074_s6 + $0x50] ss:$8 sps:$4 sm:$0xff]   ;;  %v2259_v42 = vld [vmem:[%s3074_s6 + $0x64] ss:$8 sps:$4 sm:$0xff]   ;;  %v2257_v43 = vld [vmem:[%s3074_s6 + $0x60] ss:$8 sps:$4 sm:$0xff]  }
  0xdf   : > { %2102 = vmatprep.subr.bf16.mxu0 %v2211_v9  ;;  %v2262_v44 = vld [vmem:[%s3074_s6 + $0x74] ss:$8 sps:$4 sm:$0xff]   ;;  %v2260_v45 = vld [vmem:[%s3074_s6 + $0x70] ss:$8 sps:$4 sm:$0xff]   ;;  %v2265_v46 = vld [vmem:[%s3074_s6 + $0x84] ss:$8 sps:$4 sm:$0xff]  }
  0xe0   : > { %888 = vmatpush1.bf16.msra.mxu1 %v2226_v17  ;;  %v2263_v47 = vld [vmem:[%s3074_s6 + $0x80] ss:$8 sps:$4 sm:$0xff]   ;;  %v2268_v48 = vld [vmem:[%s3074_s6 + $0x94] ss:$8 sps:$4 sm:$0xff]   ;;  %v2266_v49 = vld [vmem:[%s3074_s6 + $0x90] ss:$8 sps:$4 sm:$0xff]  }
  0xe1   : > { %889 = vmatprep.subr.bf16.mxu1 %v2227_v18  ;;  %v2271_v50 = vld [vmem:[%s3074_s6 + $0xa4] ss:$8 sps:$4 sm:$0xff]   ;;  %v2269_v51 = vld [vmem:[%s3074_s6 + $0xa0] ss:$8 sps:$4 sm:$0xff]   ;;  %v2274_v52 = vld [vmem:[%s3074_s6 + $0xb4] ss:$8 sps:$4 sm:$0xff]  }
  0xe2   : > { %2103 = vmatpush3.bf16.msra.mxu0 %v2211_v9  ;;  %v2272_v53 = vld [vmem:[%s3074_s6 + $0xb0] ss:$8 sps:$4 sm:$0xff]   ;;  %v2277_v54 = vld [vmem:[%s3074_s6 + $0xc4] ss:$8 sps:$4 sm:$0xff]   ;;  %v2275_v55 = vld [vmem:[%s3074_s6 + $0xc0] ss:$8 sps:$4 sm:$0xff]  }
  0xe3   : > { %2104 = vmatprep.subr.bf16.mxu0 %v2212_v13  ;;  %v2280_v56 = vld [vmem:[%s3074_s6 + $0xd4] ss:$8 sps:$4 sm:$0xff]   ;;  %v2278_v57 = vld [vmem:[%s3074_s6 + $0xd0] ss:$8 sps:$4 sm:$0xff]   ;;  %v2283_v9 = vld [vmem:[%s3074_s6 + $0xe4] ss:$8 sps:$4 sm:$0xff]  }
  0xe4   : > { %890 = vmatpush1.bf16.msra.mxu1 %v2229_v20  ;;  %v2281_v10 = vld [vmem:[%s3074_s6 + $0xe0] ss:$8 sps:$4 sm:$0xff]   ;;  %v2286_v11 = vld [vmem:[%s3074_s6 + $0xf4] ss:$8 sps:$4 sm:$0xff]   ;;  %v2284_v12 = vld [vmem:[%s3074_s6 + $0xf0] ss:$8 sps:$4 sm:$0xff]  }
  0xe5   : > { %891 = vmatprep.subr.bf16.mxu1 %v2230_v21  ;;  %s3118_s21 = smov (!%p622_p9, %s2671_s21), 1 }
  0xe6   : > { %2105 = vmatpush3.bf16.msra.mxu0 %v2212_v13  ;;  %v630_v13 = vlaneseq  ;;  %s624_s24 = scalar_lea.vmem %s3113_s30, %s3118_s21 }
  0xe7   : > { %2106 = vmatprep.subr.bf16.mxu0 %v2213_v16 }
  0xe8   : > { %892 = vmatpush1.bf16.msra.mxu1 %v2232_v23  ;;  %v2996_v14 = vshrl.u32 %v630_v13, 7 }
  0xe9   : > { %893 = vmatprep.subr.bf16.mxu1 %v2233_v25 }
  0xea   : > { %2107 = vmatpush3.bf16.msra.mxu0 %v2213_v16  ;;  %v2999_v15 = vsub.s32 0, %v2996_v14  ;;  %v789_v16 = vld [vmem:[#allocation7] sm:$0x3]  ;;  %v3002_v17 = vsub.s32 1, %v2996_v14 }
  0xeb   : > { %2108 = vmatprep.subr.bf16.mxu0 %v2214_v19 }
  0xec   : > { %894 = vmatpush1.bf16.msra.mxu1 %v2235_v26  ;;  %v794_v18 = vrot.slane %v789_v16, %v2999_v15 }
  0xed   : > { %895 = vmatprep.subr.bf16.mxu1 %v2236_v27 }
  0xee   : > { %2109 = vmatpush3.bf16.msra.mxu0 %v2214_v19  ;;  %v798_v19 = vrot.slane %v789_v16, %v3002_v17 }
  0xef   : > { %1146 = vmatprep.subr.bf16.mxu0 %v2241_v31 }
  0xf0   : > { %896 = vmatpush1.bf16.msra.mxu1 %v2238_v28 }
  0xf1   : > { %2111 = vmatmul.mubr.bf16.vlgmr.msra.gmra.mrb[0].mxu0 %v648_v24 }
  0xf2   : > { %1147 = vmatpush1.bf16.msra.mxu0 %v2239_v30 }
  0xf3   : > { %1148 = vmatprep.subr.bf16.mxu0 %v2244_v32 }
  0xf6   : > { %1149 = vmatpush1.bf16.msra.mxu0 %v2242_v33 }
  0xf7   : > { %1150 = vmatprep.subr.bf16.mxu0 %v2247_v34 }
  0xfa   : > { %1151 = vmatpush1.bf16.msra.mxu0 %v2245_v35 }
  0xfb   : > { %1152 = vmatprep.subr.bf16.mxu0 %v2250_v36 }
  0xfe   : > { %1153 = vmatpush1.bf16.msra.mxu0 %v2248_v37 }
  0xff   : > { %1154 = vmatprep.subr.bf16.mxu0 %v2253_v38 }
 0x102   : > { %1155 = vmatpush1.bf16.msra.mxu0 %v2251_v39 }
 0x103   : > { %1156 = vmatprep.subr.bf16.mxu0 %v2256_v40 }
 0x106   : > { %1157 = vmatpush1.bf16.msra.mxu0 %v2254_v41 }
 0x107   : > { %1158 = vmatprep.subr.bf16.mxu0 %v2259_v42 }
 0x10a   : > { %1159 = vmatpush1.bf16.msra.mxu0 %v2257_v43 }
 0x10b   : > { %1160 = vmatprep.subr.bf16.mxu0 %v2262_v44 }
 0x10e   : > { %1161 = vmatpush1.bf16.msra.mxu0 %v2260_v45 }
 0x10f   : > { %1162 = vmatprep.subr.bf16.mxu0 %v2265_v46  ;;  %v2287_v46 = vld [vmem:[%s3076_s8] sm:$0xff]  }
 0x112   : > { %1163 = vmatpush1.bf16.msra.mxu0 %v2263_v47  ;;  %v974_v47 = vld [vmem:[#allocation9] sm:$0x3] }
 0x113   : > { %1164 = vmatprep.subr.bf16.mxu0 %v2268_v48  ;;  %v979_v48 = vrot.slane %v974_v47, %v2999_v15 }
 0x116   : > { %1165 = vmatpush1.bf16.msra.mxu0 %v2266_v49  ;;  %v983_v49 = vrot.slane %v974_v47, %v3002_v17  ;;  %v2293_v47 = vld [vmem:[#allocation10 + $0x14] ss:$8 sps:$4 sm:$0xff]  }
 0x117   : > { %1166 = vmatprep.subr.bf16.mxu0 %v2271_v50 }
 0x11a   : > { %1167 = vmatpush1.bf16.msra.mxu0 %v2269_v51 }
 0x11b   : > { %1168 = vmatprep.subr.bf16.mxu0 %v2274_v52 }
 0x11e   : > { %1169 = vmatpush1.bf16.msra.mxu0 %v2272_v53 }
 0x11f   : > { %1170 = vmatprep.subr.bf16.mxu0 %v2277_v54 }
 0x122   : > { %1171 = vmatpush1.bf16.msra.mxu0 %v2275_v55 }
 0x123   : > { %1172 = vmatprep.subr.bf16.mxu0 %v2280_v56 }
 0x126   : > { %1173 = vmatpush1.bf16.msra.mxu0 %v2278_v57 }
 0x127   : > { %1174 = vmatprep.subr.bf16.mxu0 %v2283_v9 }
 0x12a   : > { %1175 = vmatpush1.bf16.msra.mxu0 %v2281_v10 }
 0x12b   : > { %1176 = vmatprep.subr.bf16.mxu0 %v2286_v11 }
 0x12e   : > { %1177 = vmatpush1.bf16.msra.mxu0 %v2284_v12 }
 0x12f   : > { %2114 = vmatprep.subr.bf16.mxu0 %v2287_v46 }
 0x1c4   : > { %v2112_v59 = vpop.f32.mrb[0].mxu0 }
 0x1c5   : > { %v754_v60 = vpop.f32.mrb[1].mxu0  ;;  %v763_v3 = vadd.f32 %v2112_v59, %v1957_v58 }
 0x1c6   : > { %v755_v61 = vadd.f32 %v1957_v58, %v754_v60  ;;  %v2113_v62 = vpop.f32.mrb[2].mxu0 }
 0x1c7   : > { %v757_v63 = vpop.f32.mrb[3].mxu0  ;;  %v770_v7 = vmax.f32 %v763_v3, 0.0 }
 0x1c8   : > { %v758_v0 = vadd.f32 %v1957_v58, %v757_v63  ;;  %v768_v1 = vmax.f32 %v755_v61, 0.0 }
 0x1c9   : > { %v772_v8 = vpack.c.bf16 %v770_v7, %v770_v7 }
 0x1ca   : > { %v769_v2 = vmax.f32 %v758_v0, 0.0 }
 0x1cc   : > { %v771_v6 = vpack.c.bf16 %v769_v2, %v768_v1 }
 0x1ce   : > { %914 = vmatmul.mubr.bf16.vlgmr.msra.gmra.mrb[0].mxu1 %v771_v6 }
 0x1cf   : > { %923 = vmatprep.mubr.bf16.mxu1 %v2583_v29 }
 0x1d6   : > { %924 = vmatmul.mubr.bf16.gmra.mrb[4].mxu1 %v772_v8 }
 0x1d7   : > { %1432 = vmatprep.mubr.bf16.mxu1 %v2583_v29 }
 0x2a1   : > { %v915_v20 = vpop.f32.mrb[0].mxu1 }
 0x2a2   : > { %v916_v21 = vadd.f32 %v915_v20, %v794_v18  ;;  %v917_v23 = vpop.f32.mrb[1].mxu1  ;;  %v1206_v20 = vld [vmem:[%s614_s18] sm:$0xff] }
 0x2a3   : > { %v918_v24 = vadd.f32 %v917_v23, %v798_v19  ;;  %v919_v25 = vpop.f32.mrb[2].mxu1  ;;  %v1207_v23 = vld [vmem:[%s614_s18 + $0x8] sm:$0xff] }
 0x2a4   : > { %v920_v26 = vadd.f32 %v919_v25, %v794_v18  ;;  %v921_v27 = vpop.f32.mrb[3].mxu1  ;;  %v932_v30 = vmax.f32 %v916_v21, 0.0 }
 0x2a5   : > { %v922_v28 = vadd.f32 %v921_v27, %v798_v19  ;;  %v933_v32 = vmax.f32 %v918_v24, 0.0 }
 0x2a6   : > { %v934_v31 = vmax.f32 %v920_v26, 0.0 }
 0x2a7   : > { %v935_v33 = vmax.f32 %v922_v28, 0.0 }
 0x2a8   : > { %v938_v34 = vpack.c.bf16 %v934_v31, %v932_v30 }
 0x2a9   : > { %v939_v35 = vpack.c.bf16 %v935_v33, %v933_v32  ;;  %v925_v36 = vpop.f32.mrb[4].mxu1 }
 0x2aa   : > { %v926_v37 = vadd.f32 %v925_v36, %v794_v18  ;;  %v927_v38 = vpop.f32.mrb[5].mxu1 }
 0x2ab   : > { %v928_v39 = vadd.f32 %v927_v38, %v798_v19  ;;  %v929_v40 = vpop.f32.mrb[6].mxu1  ;;  %1178 = vmatprep.mubr.bf16.mxu0 %v939_v35  ;;  %v1208_v35 = vld [vmem:[%s614_s18 + $0x10] sm:$0xff] }
 0x2ac   : > { %v930_v41 = vpop.f32.mrb[7].mxu1  ;;  %1179 = vmatmul.mubr.bf16.vlgmr.msra.gmra.mrb[4].mxu0 %v938_v34  ;;  %v936_v43 = vmax.f32 %v926_v37, 0.0 }
 0x2ad   : > { %v937_v42 = vmax.f32 %v928_v39, 0.0  ;;  %2115 = vmatpush3.bf16.msra.mxu0 %v2287_v46  ;;  %v2290_v46 = vld [vmem:[#allocation10 + $0x4] ss:$8 sps:$4 sm:$0xff]  }
 0x2ae   : > { %v940_v45 = vpack.c.bf16 %v936_v43, %v936_v43  ;;  %1400 = vmatprep.subr.bf16.mxu1 %v2290_v46 }
 0x2af   : > { %v941_v44 = vpack.c.bf16 %v937_v42, %v937_v42 }
 0x2b1   : > { %1188 = vmatprep.mubr.bf16.mxu0 %v941_v44 }
 0x2b4   : > { %1189 = vmatmul.mubr.bf16.gmra.mrb[8].mxu0 %v940_v45  ;;  %v2288_v45 = vld [vmem:[#allocation10] ss:$8 sps:$4 sm:$0xff]  }
 0x2b5   : > { %1401 = vmatpush1.bf16.msra.mxu1 %v2288_v45 }
 0x2b6   : > { %1402 = vmatprep.subr.bf16.mxu1 %v2293_v47 }
 0x37f   : > { %v1180_v50 = vpop.f32.mrb[4].mxu0 }
 0x380   : > { %v1181_v51 = vadd.f32 %v1180_v50, %v979_v48  ;;  %v1182_v52 = vpop.f32.mrb[5].mxu0  ;;  %v2294_v50 = vld [vmem:[#allocation10 + $0x20] ss:$8 sps:$4 sm:$0xff]  }
 0x381   : > { %v1183_v53 = vadd.f32 %v1182_v52, %v983_v49  ;;  %v1184_v54 = vpop.f32.mrb[6].mxu0  ;;  %v2297_v52 = vld [vmem:[#allocation10 + $0x30] ss:$8 sps:$4 sm:$0xff]  }
 0x382   : > { %v1722_v55 = vmul.f32 %v1181_v51, %v1181_v51  ;;  %v1185_v56 = vadd.f32 %v1184_v54, %v979_v48  ;;  %v1186_v57 = vpop.f32.mrb[7].mxu0  ;;  %v2300_v54 = vld [vmem:[#allocation10 + $0x40] ss:$8 sps:$4 sm:$0xff]  }
 0x383   : > { %v1197_v58 = vmul.f32 0.5, %v1183_v53  ;;  %v1719_v59 = vadd.f32 1.0, %v1183_v53  ;;  %v1187_v60 = vadd.f32 %v1186_v57, %v983_v49  ;;  %v2302_v53 = vld [vmem:[#allocation10 + $0x44] ss:$8 sps:$4 sm:$0xff]  }
 0x384   : > { %v1723_v61 = vmul.f32 %v1185_v56, %v1185_v56  ;;  %v2308_v57 = vld [vmem:[#allocation10 + $0x64] ss:$8 sps:$4 sm:$0xff]  }
 0x385   : > { %v1200_v62 = vmul.f32 1.442695, %v1197_v58  ;;  %v1198_v63 = vmul.f32 0.5, %v1187_v60  ;;  %v1720_v0 = vadd.f32 1.0, %v1187_v60  ;;  %v1725_v1 = vsub.f32 %v1719_v59, %v1722_v55  ;;  %v2305_v55 = vld [vmem:[#allocation10 + $0x54] ss:$8 sps:$4 sm:$0xff]  }
 0x386   : > { %v2306_v58 = vld [vmem:[#allocation10 + $0x60] ss:$8 sps:$4 sm:$0xff]   ;;  %v2311_v59 = vld [vmem:[#allocation10 + $0x74] ss:$8 sps:$4 sm:$0xff]   ;;  %v2309_v60 = vld [vmem:[#allocation10 + $0x70] ss:$8 sps:$4 sm:$0xff]  }
 0x387   : > { %2328 = vpow2.f32 %v1200_v62  ;;  %v1202_v2 = vmul.f32 1.442695, %v1198_v63  ;;  %v1190_v3 = vpop.f32.mrb[8].mxu0  ;;  %v1726_v6 = vsub.f32 %v1720_v0, %v1723_v61  ;;  %v2312_v61 = vld [vmem:[#allocation12 + $0x40] sm:$0xff]   ;;  %v2014_v62 = vld [vmem:[%s3077_s9] ss:$0 sm:$0xff] }
 0x388   : > { %v1191_v7 = vadd.f32 %v1190_v3, %v979_v48  ;;  %v1192_v8 = vpop.f32.mrb[9].mxu0  ;;  %v2291_v48 = vld [vmem:[#allocation10 + $0x10] ss:$8 sps:$4 sm:$0xff]  }
 0x389   : > { %2330 = vpow2.f32 %v1202_v2  ;;  %v1193_v9 = vadd.f32 %v1192_v8, %v983_v49  ;;  %v1194_v10 = vpop.f32.mrb[10].mxu0  ;;  %v2296_v49 = vld [vmem:[#allocation10 + $0x24] ss:$8 sps:$4 sm:$0xff]   ;;  %1403 = vmatpush1.bf16.msra.mxu1 %v2291_v48 }
 0x38a   : > { %v1724_v11 = vmul.f32 %v1191_v7, %v1191_v7  ;;  %v1195_v12 = vpop.f32.mrb[11].mxu0  ;;  %1404 = vmatprep.subr.bf16.mxu1 %v2296_v49 }
 0x38b   : > { %v1199_v13 = vmul.f32 0.5, %v1193_v9  ;;  %v1721_v16 = vadd.f32 1.0, %v1193_v9  ;;  %v2313_v9 = vld [vmem:[#allocation12] sm:$0xff]   ;;  %v2314_v12 = vld [vmem:[#allocation12 + $0x48] sm:$0xff]  }
 0x38d   : > { %v1204_v18 = vmul.f32 1.442695, %v1199_v13  ;;  %v1727_v19 = vsub.f32 %v1721_v16, %v1724_v11  ;;  %1405 = vmatpush1.bf16.msra.mxu1 %v2294_v50  ;;  %v2315_v13 = vld [vmem:[#allocation12 + $0x8] sm:$0xff]  }
 0x38f   : > { %2332 = vpow2.f32 %v1204_v18  ;;  %v2316_v18 = vld [vmem:[#allocation12 + $0x50] sm:$0xff]  }
 0x391   : > { %v2329_v21 = vpop.eup %2328 }
 0x392   : > { %v1728_v24 = vmul.f32 %v2329_v21, %v2329_v21  ;;  %v1209_v25 = vmul.f32 %v2329_v21, %v1206_v20  ;;  %v2318_v21 = vld [vmem:[#allocation12 + $0x58] sm:$0xff]  }
 0x393   : > { %v2331_v26 = vpop.eup %2330 }
 0x394   : > { %v1731_v27 = vsub.f32 %v1725_v1, %v1728_v24  ;;  %v1210_v28 = vmul.f32 %v2331_v26, %v1207_v23  ;;  %v1212_v30 = vadd.f32 %v1209_v25, %v1181_v51  ;;  %v1729_v31 = vmul.f32 %v2331_v26, %v2331_v26  ;;  %v2299_v51 = vld [vmem:[#allocation10 + $0x34] ss:$8 sps:$4 sm:$0xff]   ;;  %v2320_v24 = vld [vmem:[#allocation12 + $0x60] sm:$0xff]   ;;  %v2322_v26 = vld [vmem:[#allocation12 + $0x68] sm:$0xff]  }
 0x395   : > { %1406 = vmatprep.subr.bf16.mxu1 %v2299_v51  ;;  %v2319_v23 = vld [vmem:[#allocation12 + $0x18] sm:$0xff]   ;;  %v2321_v25 = vld [vmem:[#allocation12 + $0x20] sm:$0xff]  }
 0x396   : > { %v1734_v32 = vsel %vm1232_vm0, %v1731_v27, 0.0  ;;  %v1213_v33 = vadd.f32 %v1210_v28, %v1185_v56  ;;  %v1732_v34 = vsub.f32 %v1726_v6, %v1729_v31  ;;  %1407 = vmatpush1.bf16.msra.mxu1 %v2297_v52  ;;  %v2303_v56 = vld [vmem:[#allocation10 + $0x50] ss:$8 sps:$4 sm:$0xff]  }
 0x397   : > { %1735 = vadd.xlane.f32.xlu0 %v1734_v32  ;;  %1408 = vmatprep.subr.bf16.mxu1 %v2302_v53  ;;  %v2324_v27 = vld [vmem:[#allocation12 + $0x70] sm:$0xff]   ;;  %v2327_v31 = vld [vmem:[#allocation12 + $0x38] sm:$0xff]  }
 0x398   : > { %v1215_v36 = vpack.c.bf16 %v1213_v33, %v1212_v30  ;;  %v1737_v39 = vsel %vm1232_vm0, %v1732_v34, 0.0  ;;  %v2325_v28 = vld [vmem:[#allocation12 + $0x30] sm:$0xff]   ;;  %v2326_v30 = vld [vmem:[#allocation12 + $0x78] sm:$0xff]  }
 0x399   : > { %v2333_v37 = vpop.eup %2332  ;;  %v1308_v32 = vld [vmem:[%s3079_s11] sm:$0x3] }
 0x39a   : > { %v1211_v38 = vmul.f32 %v2333_v37, %v1208_v35  ;;  %2116 = vmatprep.mubr.msk.bf16.mxu0 %vm1232_vm0, %v1215_v36  ;;  %v1730_v40 = vmul.f32 %v2333_v37, %v2333_v37  ;;  %1409 = vmatpush1.bf16.msra.mxu1 %v2300_v54  ;;  %v1313_v33 = vrot.slane %v1308_v32, %v2999_v15 }
 0x39b   : > { %1738 = vadd.xlane.f32.xlu0 %v1737_v39  ;;  %1410 = vmatprep.subr.bf16.mxu1 %v2305_v55  ;;  %v1317_v34 = vrot.slane %v1308_v32, %v3002_v17 }
 0x39c   : > { %v1214_v41 = vadd.f32 %v1211_v38, %v1191_v7  ;;  %v1733_v42 = vsub.f32 %v1727_v19, %v1730_v40  ;;  %v2317_v19 = vld [vmem:[#allocation12 + $0x10] sm:$0xff]  }
 0x39e   : > { %v1216_v43 = vpack.c.bf16 %v1214_v41, %v1214_v41  ;;  %v1740_v44 = vsel %vm1232_vm0, %v1733_v42, 0.0  ;;  %1411 = vmatpush1.bf16.msra.mxu1 %v2303_v56 }
 0x39f   : > { %1741 = vadd.xlane.f32.xlu0 %v1740_v44  ;;  %1412 = vmatprep.subr.bf16.mxu1 %v2308_v57 }
 0x3a0   : > { %2117 = vmatmul.mubr.msk.bf16.vlgmr.msra.gmra.mrb[12].mxu0 %vm1232_vm0, %v1216_v43 }
 0x3a2   : > { %1413 = vmatpush1.bf16.msra.mxu1 %v2306_v58  ;;  %v2034_v58 = vld [vmem:[%s3081_s13] ss:$0 sm:$0xff] }
 0x3a3   : > { %1414 = vmatprep.subr.bf16.mxu1 %v2311_v59 }
 0x3a6   : > { %1415 = vmatpush1.bf16.msra.mxu1 %v2309_v60 }
 0x3a7   : > { %2066 = vmatprep.subr.bf16.mxu1 %v2312_v61 }
 0x473   : > { %v2118_v63 = vpop.f32.mrb[12].mxu0 }
 0x474   : > { %v1273_v0 = vpop.f32.mrb[13].mxu0  ;;  %v1282_v10 = vadd.f32 %v2118_v63, %v2014_v62 }
 0x475   : > { %v1274_v1 = vadd.f32 %v2014_v62, %v1273_v0  ;;  %v2119_v2 = vpop.f32.mrb[14].mxu0 }
 0x476   : > { %v1276_v3 = vpop.f32.mrb[15].mxu0  ;;  %v1289_v16 = vmax.f32 %v1282_v10, 0.0 }
 0x477   : > { %v1277_v6 = vadd.f32 %v2014_v62, %v1276_v3  ;;  %v1287_v7 = vmax.f32 %v1274_v1, 0.0 }
 0x478   : > { %v1291_v20 = vpack.c.bf16 %v1289_v16, %v1289_v16 }
 0x479   : > { %v1288_v8 = vmax.f32 %v1277_v6, 0.0 }
 0x47b   : > { %v1290_v11 = vpack.c.bf16 %v1288_v8, %v1287_v7 }
 0x47d   : > { %1433 = vmatmul.mubr.bf16.vlgmr.msra.gmra.mrb[8].mxu1 %v1290_v11 }
 0x47e   : > { %1442 = vmatprep.mubr.bf16.mxu1 %v2583_v29  ;;  %2067 = vmatpush3.bf16.msra.mxu1 %v2313_v9  ;;  %v2323_v29 = vld [vmem:[#allocation12 + $0x28] sm:$0xff]  }
 0x47f   : > { %2068 = vmatprep.subr.bf16.mxu1 %v2314_v12 }
 0x482   : > { %2069 = vmatpush3.bf16.msra.mxu1 %v2315_v13 }
 0x483   : > { %2070 = vmatprep.subr.bf16.mxu1 %v2316_v18 }
 0x485   : > { %1443 = vmatmul.mubr.bf16.gmra.mrb[12].mxu1 %v1291_v20 }
 0x486   : > { %2071 = vmatpush3.bf16.msra.mxu1 %v2317_v19 }
 0x487   : > { %2072 = vmatprep.subr.bf16.mxu1 %v2318_v21 }
 0x48a   : > { %2073 = vmatpush3.bf16.msra.mxu1 %v2319_v23 }
 0x48b   : > { %2074 = vmatprep.subr.bf16.mxu1 %v2320_v24 }
 0x48e   : > { %2075 = vmatpush3.bf16.msra.mxu1 %v2321_v25 }
 0x48f   : > { %2076 = vmatprep.subr.bf16.mxu1 %v2322_v26 }
 0x492   : > { %2077 = vmatpush3.bf16.msra.mxu1 %v2323_v29 }
 0x493   : > { %2078 = vmatprep.subr.bf16.mxu1 %v2324_v27 }
 0x496   : > { %2079 = vmatpush3.bf16.msra.mxu1 %v2325_v28 }
 0x497   : > { %2080 = vmatprep.subr.bf16.mxu1 %v2326_v30 }
 0x49a   : > { %2081 = vmatpush3.bf16.msra.mxu1 %v2327_v31 }
 0x550   : > { %v1434_v35 = vpop.f32.mrb[8].mxu1 }
 0x551   : > { %v1435_v36 = vadd.f32 %v1434_v35, %v1313_v33  ;;  %v1436_v37 = vpop.f32.mrb[9].mxu1 }
 0x552   : > { %v1437_v38 = vadd.f32 %v1436_v37, %v1317_v34  ;;  %v1438_v39 = vpop.f32.mrb[10].mxu1 }
 0x553   : > { %v1439_v40 = vadd.f32 %v1438_v39, %v1313_v33  ;;  %v1440_v41 = vpop.f32.mrb[11].mxu1  ;;  %v1451_v43 = vmax.f32 %v1435_v36, 0.0 }
 0x554   : > { %v1441_v42 = vadd.f32 %v1440_v41, %v1317_v34  ;;  %v1452_v45 = vmax.f32 %v1437_v38, 0.0 }
 0x555   : > { %v1453_v44 = vmax.f32 %v1439_v40, 0.0 }
 0x556   : > { %v1454_v46 = vmax.f32 %v1441_v42, 0.0 }
 0x557   : > { %v1457_v47 = vpack.c.bf16 %v1453_v44, %v1451_v43 }
 0x558   : > { %v1458_v48 = vpack.c.bf16 %v1454_v46, %v1452_v45  ;;  %v1444_v49 = vpop.f32.mrb[12].mxu1 }
 0x559   : > { %v1445_v50 = vadd.f32 %v1444_v49, %v1313_v33  ;;  %v1446_v51 = vpop.f32.mrb[13].mxu1 }
 0x55a   : > { %v1447_v15 = vadd.f32 %v1446_v51, %v1317_v34  ;;  %v1448_v52 = vpop.f32.mrb[14].mxu1  ;;  %1628 = vmatprep.mubr.bf16.mxu1 %v1458_v48 }
 0x55b   : > { %v1449_v17 = vpop.f32.mrb[15].mxu1  ;;  %1629 = vmatmul.mubr.bf16.vlgmr.msra.gmra.mrb[16].mxu1 %v1457_v47  ;;  %v1455_v54 = vmax.f32 %v1445_v50, 0.0 }
 0x55c   : > { %v1456_v53 = vmax.f32 %v1447_v15, 0.0 }
 0x55d   : > { %v1459_v56 = vpack.c.bf16 %v1455_v54, %v1455_v54 }
 0x55e   : > { %v1460_v55 = vpack.c.bf16 %v1456_v53, %v1456_v53 }
 0x560   : > { %1636 = vmatprep.mubr.bf16.mxu1 %v1460_v55 }
 0x563   : > { %1637 = vmatmul.mubr.bf16.gmra.mrb[20].mxu1 %v1459_v56 }
 0x62e   : > { %v2082_v57 = vpop.f32.mrb[16].mxu1 }
 0x62f   : > { %v2083_v59 = vpop.f32.mrb[17].mxu1 }
 0x630   : > { %v2084_v60 = vadd.f32 %v2083_v59, %v2082_v57  ;;  %v2085_v61 = vpop.f32.mrb[18].mxu1 }
 0x631   : > { %v2086_v62 = vpop.f32.mrb[19].mxu1 }
 0x632   : > { %v1631_v63 = vadd.f32 %v2084_v60, %v2034_v58  ;;  %v2087_v0 = vadd.f32 %v2086_v62, %v2085_v61 }
 0x634   : > { %v1644_v1 = vand.u32 2147483647, %v1631_v63  ;;  %v3032_v2 = vadd.f32 %v2087_v0, %v2034_v58  ;;  %v1674_v31 = vmax.f32 %v1631_v63, 0.0  ;;  %v1677_v32 = vmul.f32 %v1631_v63, %v2885_v4 }
 0x635   : > { %vm1662_vm2 = vcmp.ge.f32.partialorder %v1631_v63, 0.0 }
 0x636   : > { %v1647_v3 = vsub.f32 0.0, %v1644_v1  ;;  %v1645_v6 = vand.u32 2147483647, %v3032_v2  ;;  %v2088_v7 = vpop.f32.mrb[20].mxu1  ;;  %v1675_v36 = vmax.f32 %v3032_v2, 0.0  ;;  %v1680_v39 = vsub.f32 %v1674_v31, %v1677_v32 }
 0x637   : > { %v2089_v8 = vpop.f32.mrb[21].mxu1  ;;  %v1678_v44 = vmul.f32 %v3032_v2, %v2888_v5  ;;  %vm1663_vm3 = vcmp.ge.f32.partialorder %v3032_v2, 0.0 }
 0x638   : > { %v1650_v9 = vmul.f32 1.442695, %v1647_v3  ;;  %v1648_v10 = vsub.f32 0.0, %v1645_v6  ;;  %v2090_v11 = vadd.f32 %v2089_v8, %v2088_v7  ;;  %v2091_v12 = vpop.f32.mrb[22].mxu1  ;;  %v632_v3 = vadd.s32 8, %v2996_v14 }
 0x639   : > { %v2092_v13 = vpop.f32.mrb[23].mxu1  ;;  %v1681_v17 = vsub.f32 %v1675_v36, %v1678_v44  ;;  %v634_v6 = vstv %s629_s22 }
 0x63a   : > { %2334 = vpow2.f32 %v1650_v9  ;;  %v1652_v16 = vmul.f32 1.442695, %v1648_v10  ;;  %v3035_v18 = vadd.f32 %v2090_v11, %v2034_v58  ;;  %v636_v7 = vadd.s32 %v634_v6, %v632_v3 }
 0x63b   : > { %v635_v8 = vadd.s32 %v634_v6, %v2996_v14  ;;  %v633_v9 = vadd.s32 16, %v2996_v14 }
 0x63c   : > { %2336 = vpow2.f32 %v1652_v16  ;;  %v1646_v19 = vand.u32 2147483647, %v3035_v18  ;;  %v1676_v54 = vmax.f32 %v3035_v18, 0.0  ;;  %v1679_v55 = vmul.f32 %v3035_v18, %v2893_v22  ;;  %v1736_v22 = vpop.xlane.xlu0 %1735 }
 0x63d   : > { %vm1664_vm5 = vcmp.ge.f32.partialorder %v3035_v18, 0.0  ;;  %vm639_vm7 = vcmp.lt.s32.totalorder %v636_v7, 40  ;;  %v1743_v12 = vmul.f32 -0.5, %v1736_v22  ;;  %vm638_vm8 = vcmp.lt.s32.totalorder %v635_v8, 40 }
 0x63e   : > { %v1649_v20 = vsub.f32 0.0, %v1646_v19  ;;  %v1682_v0 = vsub.f32 %v1676_v54, %v1679_v55  ;;  %v637_v13 = vadd.s32 %v634_v6, %v633_v9  ;;  %v2584_v19 = vmov 0.0  }
 0x640   : > { %v1654_v21 = vmul.f32 1.442695, %v1649_v20  ;;  %v1739_v10 = vpop.xlane.xlu0 %1738  ;;  %v1955_v20 = vsel %vm639_vm7, 1.0, %v2584_v19  ;;  %vm640_vm9 = vcmp.lt.s32.totalorder %v637_v13, 40 }
 0x641   : > { %v1744_v16 = vmul.f32 -0.5, %v1739_v10 }
 0x642   : > { %2338 = vpow2.f32 %v1654_v21 }
 0x644   : > { %v2335_v23 = vpop.eup %2334 }
 0x645   : > { %v1656_v24 = vadd.f32 1.0, %v2335_v23  ;;  %v1686_v29 = vmul.f32 -0.5, %v2335_v23  ;;  %v1689_v34 = vand.u32 2147483647, %v2335_v23 }
 0x646   : > { %v2337_v25 = vpop.eup %2336 }
 0x647   : > { %2340 = vlog2.f32 %v1656_v24  ;;  %v1657_v26 = vadd.f32 1.0, %v2337_v25  ;;  %v1695_v28 = vmul.f32 -0.5, %v2337_v25  ;;  %v1687_v33 = vadd.f32 1.0, %v1686_v29 }
 0x648   : > { %2342 = vrcp.f32 %v1656_v24  ;;  %v1698_v42 = vand.u32 2147483647, %v2337_v25  ;;  %vm1690_vm1 = vcmp.lt.f32.partialorder %v1689_v34, 0.0004427343  ;;  %v1954_v24 = vsel %vm638_vm8, 1.0, %v2584_v19 }
 0x649   : > { %2344 = vrcp.f32 %v1657_v26  ;;  %v1696_v37 = vadd.f32 1.0, %v1695_v28  ;;  %v1688_v41 = vmul.f32 %v2335_v23, %v1687_v33  ;;  %v1956_v28 = vsel %vm640_vm9, 1.0, %v2584_v19 }
 0x64a   : > { %2346 = vlog2.f32 %v1657_v26  ;;  %vm1699_vm4 = vcmp.lt.f32.partialorder %v1698_v42, 0.0004427343 }
 0x64b   : > { %v1697_v15 = vmul.f32 %v2337_v25, %v1696_v37 }
 0x64c   : > { %v2339_v27 = vpop.eup %2338 }
 0x64d   : > { %v1658_v30 = vadd.f32 1.0, %v2339_v27  ;;  %v1704_v45 = vmul.f32 -0.5, %v2339_v27  ;;  %v1707_v56 = vand.u32 2147483647, %v2339_v27 }
 0x64f   : > { %2348 = vrcp.f32 %v1658_v30  ;;  %v1705_v5 = vadd.f32 1.0, %v1704_v45  ;;  %vm1708_vm6 = vcmp.lt.f32.partialorder %v1707_v56, 0.0004427343 }
 0x650   : > { %2350 = vlog2.f32 %v1658_v30 }
 0x651   : > { %v2341_v35 = vpop.eup %2340  ;;  %v1706_v62 = vmul.f32 %v2339_v27, %v1705_v5 }
 0x652   : > { %v2343_v38 = vpop.eup %2342  ;;  %v1685_v40 = vmul.f32 0.6931472, %v2341_v35 }
 0x653   : > { %v2345_v43 = vpop.eup %2344  ;;  %v1665_v4 = vmul.f32 %v2343_v38, %v2335_v23  ;;  %v1742_v23 = vpop.xlane.xlu0 %1741 }
 0x654   : > { %v2347_v46 = vpop.eup %2346  ;;  %v1691_v47 = vsel %vm1690_vm1, %v1688_v41, %v1685_v40  ;;  %v1666_v48 = vmul.f32 %v2345_v43, %v2337_v25  ;;  %v1745_v29 = vmul.f32 -0.5, %v1742_v23 }
 0x655   : > { %v1710_v49 = vadd.f32 %v1691_v47, %v1680_v39  ;;  %v1668_v50 = vsel %vm1662_vm2, %v2343_v38, %v1665_v4  ;;  %v1694_v51 = vmul.f32 0.6931472, %v2347_v46 }
 0x656   : > { %1671 = vst [vmem:[%s3044_s19] sm:$0xff] %v1668_v50  ;;  %v1669_v52 = vsel %vm1663_vm3, %v2345_v43, %v1666_v48 }
 0x657   : > { %1713 = vadd.xlane.f32.xlu1 %v1710_v49  ;;  %1672 = vst [vmem:[%s3044_s19 + $0x8] sm:$0xff] %v1669_v52  ;;  %v1700_v53 = vsel %vm1699_vm4, %v1697_v15, %v1694_v51 }
 0x658   : > { %v1711_v58 = vadd.f32 %v1700_v53, %v1681_v17 }
 0x659   : > { %v2349_v57 = vpop.eup %2348 }
 0x65a   : > { %v2351_v59 = vpop.eup %2350  ;;  %v1667_v60 = vmul.f32 %v2349_v57, %v2339_v27 }
 0x65b   : > { %1715 = vadd.xlane.f32.xlu1 %v1711_v58  ;;  %v1703_v61 = vmul.f32 0.6931472, %v2351_v59 }
 0x65c   : > { %v1670_v63 = vsel %vm1664_vm5, %v2349_v57, %v1667_v60 }
 0x65d   : > { %1673 = vst [vmem:[%s3044_s19 + $0x10] sm:$0xff] %v1670_v63  ;;  %v1709_v1 = vsel %vm1708_vm6, %v1706_v62, %v1703_v61 }
 0x65e   : > { %v1712_v2 = vadd.f32 %v1709_v1, %v1682_v0 }
 0x660   : > { %1717 = vadd.xlane.f32.xlu1 %v1712_v2 }
 0x6e4   : > { %v1714_v11 = vpop.xlane.xlu1 %1713 }
 0x6e5   : > { %v1746_v18 = vadd.f32 %v1743_v12, %v1714_v11 }
 0x6e7   : > { %v1749_v27 = vmul.f32 %v1954_v24, %v1746_v18 }
 0x6e8   : > { %v1716_v21 = vpop.xlane.xlu1 %1715 }
 0x6e9   : > { %v1747_v25 = vadd.f32 %v1744_v16, %v1716_v21  ;;  %v1753_v33 = vsel %vm1752_vm10, %v1749_v27, 0.0 }
 0x6eb   : > { %v1750_v26 = vmul.f32 %v1955_v20, %v1747_v25 }
 0x6ed   : > { %v1718_v14 = vpop.xlane.xlu1 %1717  ;;  %v1754_v31 = vsel %vm1752_vm10, %v1750_v26, 0.0 }
 0x6ee   : > { %v1748_v30 = vadd.f32 %v1745_v29, %v1718_v14  ;;  %v1755_v34 = vadd.f32 %v1754_v31, %v1753_v33 }
 0x6f0   : > { %v1751_v32 = vmul.f32 %v1956_v28, %v1748_v30 }
 0x6f2   : > { %v1756_v35 = vsel %vm1752_vm10, %v1751_v32, 0.0 }
 0x6f3   : > { %v1757_v36 = vadd.f32 %v1756_v35, %v1755_v34 }
 0x6f5   : > { %1758 = vadd.xlane.f32.xlu0 %v1757_v36 }
 0x782   : > { %v1759_v37 = vpop.xlane.xlu0 %1758 }
 0x783   : > { %v1760_v38 = vrot.slane %v1759_v37, 4 }
 0x785   : > { %v1761_v39 = vadd.f32 %v1760_v38, %v1759_v37 }
 0x787   : > { %v1762_v40 = vrot.slane %v1761_v39, 2 }
 0x789   : > { %v1763_v41 = vadd.f32 %v1762_v40, %v1761_v39 }
 0x78b   : > { %v1764_v42 = vrot.slane %v1763_v41, 1 }
 0x78d   : > { %v1765_v43 = vadd.f32 %v1764_v42, %v1763_v41 }
 0x78f   : > { %2120 = vpush %v1765_v43 }
 0x7c0   : > { %s2121_s16 = spop %2120 }
 0x7c1   : > { %v1767_v4 = vstv %s2121_s16 }
 0x7c2   : > { %1769 = vst.msk [vmem:[%s624_s24] sm:$0x1] %vm1768_vm11, %v1767_v4 }
 0x7c3 PF: > { %s3114_s15 = sld [smem:[#allocation17_spill]] }
 0x7c9   : > { %s30_s18 = sadd.s32 1, %s3114_s15  }
 0x7ca   : > { %p27_p10 = scmp.ge.s32.totalorder %s30_s18, 4  }
 0x7cc   :  { %29 = sbr.rel (!%p27_p10) target bundleno = 10 (0xa), region = 150 }
 0x7d3   :  { %1804 = vsyncpa [#allocation3], 1 }
 0x7d4   :  { %1806 = vsyncpa [#allocation3 + $0x1], 1 }
 0x7d5   :  { %1807 = vsyncpa [#allocation5], 1 }
 0x7d6   :  { %1808 = vsyncpa [#allocation8], 1 }
 0x7d7   :  { %1809 = vsyncpa [#allocation11], 1 }

</bundles_post_ra>
